<compile_context>
chip_gen: v7x
topology: tpu7x:2x2x1
jax: 0.10.0
libtpu: 0.0.40
codegen_flags: <defaults>
</compile_context>

<pallas_src>
import math
import functools

import jax
import jax.numpy as jnp
from jax.experimental import pallas as pl
from jax.experimental.pallas import tpu as pltpu


def encoder_layer_kernel(xq_ref, xkv_ref, mask_ref,
                         wqkv_ref, bqkv_ref, wo_ref, bo_ref,
                         ln1g_ref, ln1b_ref, w1_ref, b1_ref, w2_ref, b2_ref,
                         ln2g_ref, ln2b_ref,
                         o_ref, k_s_ref, v_s_ref, *, n_heads, cache_kv):
    xq = xq_ref[0]                     # (TQ, D) query-row tile, native dtype
    dt = xq.dtype                      # MXU operand dtype (bf16 recommended)
    TQ, D = xq.shape
    S = xkv_ref.shape[1]
    dh = D // n_heads
    scale = 1.0 / math.sqrt(dh)

    # ---- K/V projection for the full sequence, cached per batch element ----
    def project_kv():
        xkv = xkv_ref[0]               # (S, D)
        kv = (jnp.dot(xkv, wqkv_ref[:, D:], preferred_element_type=jnp.float32)
              + bqkv_ref[:, D:].astype(jnp.float32)).astype(dt)       # (S, 2D)
        # per-head relayout done ONCE per batch element (not per tile per head)
        for h in range(n_heads):
            k_s_ref[h] = kv[:, h * dh:(h + 1) * dh]
            v_s_ref[h] = kv[:, D + h * dh:D + (h + 1) * dh]

    if cache_kv:
        pl.when(pl.program_id(1) == 0)(project_kv)   # qi axis is "arbitrary"
    else:
        project_kv()                                  # B == 1: both axes parallel

    # additive mask bias (0 keep / -1e9 pad); (1, 1, S), broadcast implicitly
    bias = (mask_ref[...].astype(jnp.float32) - 1.0) * 1e9

    # ---- Q projection for this row tile (1/sqrt(dh) folded in) ----
    q = (jnp.dot(xq, wqkv_ref[:, :D], preferred_element_type=jnp.float32)
         + bqkv_ref[:, :D].astype(jnp.float32)) * scale
    q = q.astype(dt)
    qh = jnp.stack([q[:, h * dh:(h + 1) * dh] for h in range(n_heads)],
                   axis=0)                                            # (H, TQ, dh)

    # ---- attention, batched over heads ----
    k = k_s_ref[...]                   # (H, S, dh)
    v = v_s_ref[...]                   # (H, S, dh)
    s = jnp.einsum('hqd,hkd->hqk', qh, k,
                   preferred_element_type=jnp.float32)                # (H, TQ, S)
    s = s + bias
    m = jnp.max(s, axis=-1, keepdims=True)
    p = jnp.exp(s - m)
    p = p * pl.reciprocal(jnp.sum(p, axis=-1, keepdims=True), approx=True)
    ctx = jnp.einsum('hqk,hkd->hqd', p.astype(dt), v,
                     preferred_element_type=jnp.float32)              # (H, TQ, dh)
    ctx = jnp.concatenate([ctx[h] for h in range(n_heads)],
                          axis=-1).astype(dt)                         # (TQ, D)

    # single full-contraction (K = D) output projection
    attn = (jnp.dot(ctx, wo_ref[...], preferred_element_type=jnp.float32)
            + bo_ref[...].astype(jnp.float32))                        # (TQ, D) f32

    def layernorm(v32, g_ref, b_ref):
        mu = jnp.mean(v32, axis=-1, keepdims=True)
        var = jnp.mean((v32 - mu) ** 2, axis=-1, keepdims=True)
        return ((v32 - mu) * jax.lax.rsqrt(var + 1e-5)
                * g_ref[...].astype(jnp.float32) + b_ref[...].astype(jnp.float32))

    # dropout is identity in eval mode
    x1 = layernorm(xq.astype(jnp.float32) + attn, ln1g_ref, ln1b_ref)  # (TQ, D)

    # ---- position-wise feed-forward on this row tile ----
    h1 = jnp.maximum(
        jnp.dot(x1.astype(dt), w1_ref[...], preferred_element_type=jnp.float32)
        + b1_ref[...].astype(jnp.float32), 0.0)                        # (TQ, F)
    ffn = (jnp.dot(h1.astype(dt), w2_ref[...], preferred_element_type=jnp.float32)
           + b2_ref[...].astype(jnp.float32))                          # (TQ, D)
    x2 = layernorm(x1 + ffn, ln2g_ref, ln2b_ref)

    o_ref[0] = x2.astype(o_ref.dtype)


# Probed once: whether this jax version accepts pipeline_mode=pl.Buffered(1).
_SINGLE_BUFFER_WEIGHTS = None


def _vmem_limit_bytes():
    """Per-generation VMEM budget with headroom for compiler-internal scratch."""
    phys = 64 * 1024 * 1024            # conservative default (v7x per-core VMEM)
    try:
        phys = int(pltpu.get_tpu_info().vmem_capacity_bytes)
    except Exception:
        pass
    return min((phys * 3) // 4, 112 * 1024 * 1024)   # ~48 MiB v7x, ~96 MiB v5e/v6e


def _pick_q_tile(seq_len, batch):
    """Query-row tile: divisor of S, multiple of 8 (sublane), capped at 512."""
    cands = [c for c in (512, 256, 128, 64, 32, 16, 8) if seq_len % c == 0]
    if seq_len <= 512:
        smaller = [c for c in cands if c < seq_len]
        if batch == 1 and smaller:
            return smaller[0]          # >=2 q-tiles so both v7x TensorCores get work
        return seq_len
    if cands:
        return cands[0]
    # TODO(synk): prime / non-multiple-of-8 long sequences fall back to one big tile.
    return seq_len


def encoder_layer_call(x, mask, packed_params, n_heads, q_tile=None):
    global _SINGLE_BUFFER_WEIGHTS
    B, S, D = x.shape
    assert D % n_heads == 0
    dh = D // n_heads
    mask = mask.reshape(B, 1, S)       # accept (B, 1, S) or (B, 1, 1, S)
    tq = q_tile or _pick_q_tile(S, B)
    assert S % tq == 0, "sequence length must be divisible by the query tile"
    n_qt = S // tq
    # Cache K/V across query tiles (qi must then run sequentially).  When B == 1
    # prefer two fully parallel grid axes (v7x has 2 TensorCores) and recompute.
    cache_kv = not (B == 1 and n_qt > 1)
    weights = list(packed_params)

    kernel = functools.partial(encoder_layer_kernel, n_heads=n_heads,
                               cache_kv=cache_kv)
    xq_spec = pl.BlockSpec((1, tq, D), lambda b, qi: (b, qi, 0))
    xkv_spec = pl.BlockSpec((1, S, D), lambda b, qi: (b, 0, 0))
    mask_spec = pl.BlockSpec((1, 1, S), lambda b, qi: (b, 0, 0))
    semantics = ("parallel", "arbitrary") if cache_kv else ("parallel", "parallel")

    def run(single_buffer_weights):
        wspecs = []
        for w in weights:              # all packed weights/biases are 2-D
            if single_buffer_weights:
                # constant block index over the whole grid -> no double buffering
                wspecs.append(pl.BlockSpec(w.shape, lambda b, qi: (0, 0),
                                           pipeline_mode=pl.Buffered(1)))
            else:
                wspecs.append(pl.BlockSpec(w.shape, lambda b, qi: (0, 0)))
        return pl.pallas_call(
            kernel,
            out_shape=jax.ShapeDtypeStruct((B, S, D), x.dtype),
            grid_spec=pltpu.PrefetchScalarGridSpec(
                num_scalar_prefetch=0,
                grid=(B, n_qt),
                in_specs=[xq_spec, xkv_spec, mask_spec] + wspecs,
                out_specs=xq_spec,
                scratch_shapes=[pltpu.VMEM((n_heads, S, dh), x.dtype),   # K cache
                                pltpu.VMEM((n_heads, S, dh), x.dtype)],  # V cache
            ),
            compiler_params=pltpu.CompilerParams(
                dimension_semantics=semantics,
                vmem_limit_bytes=_vmem_limit_bytes()),
        )(x, x, mask, *weights)

    if _SINGLE_BUFFER_WEIGHTS is None:
        try:
            out = run(True)
            _SINGLE_BUFFER_WEIGHTS = True
            return out
        except Exception:              # pl.Buffered(1) unsupported -> default buffering
            _SINGLE_BUFFER_WEIGHTS = False
    return run(_SINGLE_BUFFER_WEIGHTS)


def init_encoder_params(key, d_model, n_heads, d_ffn, n_layers):
    params = []
    for _ in range(n_layers):
        key, *ks = jax.random.split(key, 7)
        sc = 0.05
        wq = jax.random.normal(ks[0], (d_model, d_model), jnp.float32) * sc
        wk = jax.random.normal(ks[1], (d_model, d_model), jnp.float32) * sc
        wv = jax.random.normal(ks[2], (d_model, d_model), jnp.float32) * sc
        wo = jax.random.normal(ks[3], (d_model, d_model), jnp.float32) * sc
        w1 = jax.random.normal(ks[4], (d_model, d_ffn), jnp.float32) * sc
        w2 = jax.random.normal(ks[5], (d_ffn, d_model), jnp.float32) * sc
        bq = jnp.zeros((1, d_model), jnp.float32)
        bk = jnp.zeros((1, d_model), jnp.float32)
        bv = jnp.zeros((1, d_model), jnp.float32)
        bo = jnp.zeros((1, d_model), jnp.float32)
        b1 = jnp.zeros((1, d_ffn), jnp.float32)
        b2 = jnp.zeros((1, d_model), jnp.float32)
        ln1g = jnp.ones((1, d_model), jnp.float32)
        ln1b = jnp.zeros((1, d_model), jnp.float32)
        ln2g = jnp.ones((1, d_model), jnp.float32)
        ln2b = jnp.zeros((1, d_model), jnp.float32)
        params.append((wq, bq, wk, bk, wv, bv, wo, bo,
                       ln1g, ln1b, w1, b1, w2, b2, ln2g, ln2b))
    return params


def cast_params(params, dtype):
    return [tuple(jnp.asarray(w, dtype) for w in layer) for layer in params]


def pack_layer_params(layer_params):
    """Fuse Wq/Wk/Wv (and biases) into one (D, 3D) / (1, 3D) pair."""
    (wq, bq, wk, bk, wv, bv, wo, bo,
     ln1g, ln1b, w1, b1, w2, b2, ln2g, ln2b) = layer_params
    wqkv = jnp.concatenate([wq, wk, wv], axis=1)
    bqkv = jnp.concatenate([bq, bk, bv], axis=1)
    return (wqkv, bqkv, wo, bo, ln1g, ln1b, w1, b1, w2, b2, ln2g, ln2b)


def encoder_forward(x, mask, params, n_heads, q_tile=None):
    # TODO(synk): cross-pallas_call prefetch of next-layer weights (P10) not implemented.
    for layer_params in params:
        x = encoder_layer_call(x, mask, pack_layer_params(layer_params),
                               n_heads, q_tile)
    return x


# ---------------- pure-JAX reference (for correctness check) ----------------
def encoder_forward_ref(x, mask, params, n_heads):
    def layernorm(v, g, b):
        mu = jnp.mean(v, -1, keepdims=True)
        var = jnp.mean((v - mu) ** 2, -1, keepdims=True)
        return (v - mu) / jnp.sqrt(var + 1e-5) * g + b

    B, S, D = x.shape
    dh = D // n_heads
    m = mask.reshape(B, 1, 1, S)
    for (wq, bq, wk, bk, wv, bv, wo, bo,
         ln1g, ln1b, w1, b1, w2, b2, ln2g, ln2b) in params:
        q = (x @ wq + bq).reshape(B, S, n_heads, dh).transpose(0, 2, 1, 3)
        k = (x @ wk + bk).reshape(B, S, n_heads, dh).transpose(0, 2, 1, 3)
        v = (x @ wv + bv).reshape(B, S, n_heads, dh).transpose(0, 2, 1, 3)
        scores = jnp.einsum("bhqd,bhkd->bhqk", q, k) / math.sqrt(dh)
        scores = jnp.where(m > 0.5, scores, -1e9)
        p = jax.nn.softmax(scores, axis=-1)
        attn = jnp.einsum("bhqk,bhkd->bhqd", p, v).transpose(0, 2, 1, 3).reshape(B, S, D)
        attn = attn @ wo + bo
        x = layernorm(x + attn, ln1g, ln1b)
        h = jnp.maximum(x @ w1 + b1, 0.0)
        ffn = h @ w2 + b2
        x = layernorm(x + ffn, ln2g, ln2b)
    return x


if __name__ == "__main__":
    B, S, D, H, F, L = 2, 8, 32, 4, 64, 2

    key = jax.random.PRNGKey(0)
    kx, kp = jax.random.split(key)
    x = jax.random.normal(kx, (B, S, D), jnp.float32)

    # src_mask: (B, 1, 1, S) as in the PyTorch module; batch 1 pads the last 2 positions
    mask = jnp.ones((B, 1, 1, S), jnp.float32)
    mask = mask.at[1, :, :, S - 2:].set(0.0)

    params = init_encoder_params(kp, D, H, F, L)
    ref = encoder_forward_ref(x, mask, params, H)

    # f32 path (tolerance covers approx-reciprocal softmax normalization)
    out_f32 = jax.block_until_ready(encoder_forward(x, mask, params, H))
    assert out_f32.shape == (B, S, D)
    assert jnp.allclose(out_f32, ref, atol=1e-2, rtol=1e-2), "f32 mismatch vs reference"

    # bf16 path: recommended MXU operand dtype (f32 accumulation inside the kernel)
    x_bf16 = x.astype(jnp.bfloat16)
    params_bf16 = cast_params(params, jnp.bfloat16)
    out_bf16 = jax.block_until_ready(
        encoder_forward(x_bf16, mask, params_bf16, H)).astype(jnp.float32)
    assert out_bf16.shape == (B, S, D)
    assert jnp.allclose(out_bf16, ref, atol=1e-1, rtol=1e-1), "bf16 mismatch vs reference"

    print("KERNEL_OK")
</pallas_src>

<mosaic_0001>
module attributes {stable_mosaic.version = 11 : i64} {
  func.func @encoder_layer_kernel(%arg0: i32, %arg1: i32, %arg2: memref<1x8x32xf32, #tpu.memory_space<vmem>>, %arg3: memref<1x8x32xf32, #tpu.memory_space<vmem>>, %arg4: memref<1x1x8xf32, #tpu.memory_space<vmem>>, %arg5: memref<32x96xf32, #tpu.memory_space<vmem>>, %arg6: memref<1x96xf32, #tpu.memory_space<vmem>>, %arg7: memref<32x32xf32, #tpu.memory_space<vmem>>, %arg8: memref<1x32xf32, #tpu.memory_space<vmem>>, %arg9: memref<1x32xf32, #tpu.memory_space<vmem>>, %arg10: memref<1x32xf32, #tpu.memory_space<vmem>>, %arg11: memref<32x64xf32, #tpu.memory_space<vmem>>, %arg12: memref<1x64xf32, #tpu.memory_space<vmem>>, %arg13: memref<64x32xf32, #tpu.memory_space<vmem>>, %arg14: memref<1x32xf32, #tpu.memory_space<vmem>>, %arg15: memref<1x32xf32, #tpu.memory_space<vmem>>, %arg16: memref<1x32xf32, #tpu.memory_space<vmem>>, %arg17: memref<1x8x32xf32, #tpu.memory_space<vmem>>, %arg18: memref<4x8x8xf32, #tpu.memory_space<vmem>>, %arg19: memref<4x8x8xf32, #tpu.memory_space<vmem>>) attributes {dimension_semantics = [#tpu.dimension_semantics<parallel>, #tpu.dimension_semantics<arbitrary>], iteration_bounds = array<i64: 2, 1>, scalar_prefetch = 0 : i64, scratch_operands = 2 : i64, tpu.core_type = #tpu.core_type<tc>, window_params = [{transform_indices = @transform_0, window_bounds = array<i64: 1, 8, 32>}, {transform_indices = @transform_1, window_bounds = array<i64: 1, 8, 32>}, {transform_indices = @transform_2, window_bounds = array<i64: 1, 1, 8>}, {pipeline_mode = #tpu.pipeline_mode<synchronous>, transform_indices = @transform_3, window_bounds = array<i64: 32, 96>}, {pipeline_mode = #tpu.pipeline_mode<synchronous>, transform_indices = @transform_4, window_bounds = array<i64: 1, 96>}, {pipeline_mode = #tpu.pipeline_mode<synchronous>, transform_indices = @transform_5, window_bounds = array<i64: 32, 32>}, {pipeline_mode = #tpu.pipeline_mode<synchronous>, transform_indices = @transform_6, window_bounds = array<i64: 1, 32>}, {pipeline_mode = #tpu.pipeline_mode<synchronous>, transform_indices = @transform_7, window_bounds = array<i64: 1, 32>}, {pipeline_mode = #tpu.pipeline_mode<synchronous>, transform_indices = @transform_8, window_bounds = array<i64: 1, 32>}, {pipeline_mode = #tpu.pipeline_mode<synchronous>, transform_indices = @transform_9, window_bounds = array<i64: 32, 64>}, {pipeline_mode = #tpu.pipeline_mode<synchronous>, transform_indices = @transform_10, window_bounds = array<i64: 1, 64>}, {pipeline_mode = #tpu.pipeline_mode<synchronous>, transform_indices = @transform_11, window_bounds = array<i64: 64, 32>}, {pipeline_mode = #tpu.pipeline_mode<synchronous>, transform_indices = @transform_12, window_bounds = array<i64: 1, 32>}, {pipeline_mode = #tpu.pipeline_mode<synchronous>, transform_indices = @transform_13, window_bounds = array<i64: 1, 32>}, {pipeline_mode = #tpu.pipeline_mode<synchronous>, transform_indices = @transform_14, window_bounds = array<i64: 1, 32>}, {transform_indices = @transform_15, window_bounds = array<i64: 1, 8, 32>}]} {
    %c0 = arith.constant 0 : index
    %c0_0 = arith.constant 0 : index
    %c0_1 = arith.constant 0 : index
    %0 = vector.load %arg2[%c0, %c0_0, %c0_1] : memref<1x8x32xf32, #tpu.memory_space<vmem>>, vector<1x8x32xf32>
    %1 = vector.shape_cast %0 : vector<1x8x32xf32> to vector<8x32xf32>
    %c0_i32 = arith.constant 0 : i32
    %2 = arith.cmpi eq, %arg1, %c0_i32 : i32
    %3 = arith.extui %2 : i1 to i32
    %c0_i32_2 = arith.constant 0 : i32
    %4 = arith.cmpi ne, %3, %c0_i32_2 : i32
    scf.if %4 {
      %c0_60 = arith.constant 0 : index
      %c0_61 = arith.constant 0 : index
      %c0_62 = arith.constant 0 : index
      %121 = vector.load %arg3[%c0_60, %c0_61, %c0_62] : memref<1x8x32xf32, #tpu.memory_space<vmem>>, vector<1x8x32xf32>
      %122 = vector.shape_cast %121 : vector<1x8x32xf32> to vector<8x32xf32>
      %c0_63 = arith.constant 0 : index
      %c32 = arith.constant 32 : index
      %123 = vector.load %arg5[%c0_63, %c32] : memref<32x96xf32, #tpu.memory_space<vmem>>, vector<32x64xf32>
      %cst_64 = arith.constant dense<0.000000e+00> : vector<8x64xf32>
      %124 = tpu.matmul %122, %123, %cst_64 {dimension_numbers = #tpu.dot_dimension_numbers<[1], [0], [0], [1], [0, 0, 1, 1], [], []>} : vector<8x32xf32>, vector<32x64xf32>, vector<8x64xf32> -> vector<8x64xf32>
      %c0_65 = arith.constant 0 : index
      %c32_66 = arith.constant 32 : index
      %125 = vector.load %arg6[%c0_65, %c32_66] : memref<1x96xf32, #tpu.memory_space<vmem>>, vector<1x64xf32>
      %126 = vector.broadcast %125 : vector<1x64xf32> to vector<8x64xf32>
      %127 = arith.addf %124, %126 : vector<8x64xf32>
      %128 = vector.extract_strided_slice %127 {offsets = [0, 0], sizes = [8, 8], strides = [1, 1]} : vector<8x64xf32> to vector<8x8xf32>
      %c0_67 = arith.constant 0 : index
      %c0_68 = arith.constant 0 : index
      %c0_69 = arith.constant 0 : index
      %129 = vector.load %arg18[%c0_67, %c0_68, %c0_69] : memref<4x8x8xf32, #tpu.memory_space<vmem>>, vector<1x8x8xf32>
      %130 = vector.shape_cast %129 : vector<1x8x8xf32> to vector<8x8xf32>
      %131 = vector.shape_cast %128 : vector<8x8xf32> to vector<1x8x8xf32>
      tpu.vector_store %arg18[%c0_67, %c0_68, %c0_69], %131 {strides = array<i32>} : memref<4x8x8xf32, #tpu.memory_space<vmem>>, vector<1x8x8xf32>,
      %132 = vector.extract_strided_slice %127 {offsets = [0, 32], sizes = [8, 8], strides = [1, 1]} : vector<8x64xf32> to vector<8x8xf32>
      %c0_70 = arith.constant 0 : index
      %c0_71 = arith.constant 0 : index
      %c0_72 = arith.constant 0 : index
      %133 = vector.load %arg19[%c0_70, %c0_71, %c0_72] : memref<4x8x8xf32, #tpu.memory_space<vmem>>, vector<1x8x8xf32>
      %134 = vector.shape_cast %133 : vector<1x8x8xf32> to vector<8x8xf32>
      %135 = vector.shape_cast %132 : vector<8x8xf32> to vector<1x8x8xf32>
      tpu.vector_store %arg19[%c0_70, %c0_71, %c0_72], %135 {strides = array<i32>} : memref<4x8x8xf32, #tpu.memory_space<vmem>>, vector<1x8x8xf32>,
      %136 = vector.extract_strided_slice %127 {offsets = [0, 8], sizes = [8, 8], strides = [1, 1]} : vector<8x64xf32> to vector<8x8xf32>
      %c1 = arith.constant 1 : index
      %c0_73 = arith.constant 0 : index
      %c0_74 = arith.constant 0 : index
      %137 = vector.load %arg18[%c1, %c0_73, %c0_74] : memref<4x8x8xf32, #tpu.memory_space<vmem>>, vector<1x8x8xf32>
      %138 = vector.shape_cast %137 : vector<1x8x8xf32> to vector<8x8xf32>
      %139 = vector.shape_cast %136 : vector<8x8xf32> to vector<1x8x8xf32>
      tpu.vector_store %arg18[%c1, %c0_73, %c0_74], %139 {strides = array<i32>} : memref<4x8x8xf32, #tpu.memory_space<vmem>>, vector<1x8x8xf32>,
      %140 = vector.extract_strided_slice %127 {offsets = [0, 40], sizes = [8, 8], strides = [1, 1]} : vector<8x64xf32> to vector<8x8xf32>
      %c1_75 = arith.constant 1 : index
      %c0_76 = arith.constant 0 : index
      %c0_77 = arith.constant 0 : index
      %141 = vector.load %arg19[%c1_75, %c0_76, %c0_77] : memref<4x8x8xf32, #tpu.memory_space<vmem>>, vector<1x8x8xf32>
      %142 = vector.shape_cast %141 : vector<1x8x8xf32> to vector<8x8xf32>
      %143 = vector.shape_cast %140 : vector<8x8xf32> to vector<1x8x8xf32>
      tpu.vector_store %arg19[%c1_75, %c0_76, %c0_77], %143 {strides = array<i32>} : memref<4x8x8xf32, #tpu.memory_space<vmem>>, vector<1x8x8xf32>,
      %144 = vector.extract_strided_slice %127 {offsets = [0, 16], sizes = [8, 8], strides = [1, 1]} : vector<8x64xf32> to vector<8x8xf32>
      %c2 = arith.constant 2 : index
      %c0_78 = arith.constant 0 : index
      %c0_79 = arith.constant 0 : index
      %145 = vector.load %arg18[%c2, %c0_78, %c0_79] : memref<4x8x8xf32, #tpu.memory_space<vmem>>, vector<1x8x8xf32>
      %146 = vector.shape_cast %145 : vector<1x8x8xf32> to vector<8x8xf32>
      %147 = vector.shape_cast %144 : vector<8x8xf32> to vector<1x8x8xf32>
      tpu.vector_store %arg18[%c2, %c0_78, %c0_79], %147 {strides = array<i32>} : memref<4x8x8xf32, #tpu.memory_space<vmem>>, vector<1x8x8xf32>,
      %148 = vector.extract_strided_slice %127 {offsets = [0, 48], sizes = [8, 8], strides = [1, 1]} : vector<8x64xf32> to vector<8x8xf32>
      %c2_80 = arith.constant 2 : index
      %c0_81 = arith.constant 0 : index
      %c0_82 = arith.constant 0 : index
      %149 = vector.load %arg19[%c2_80, %c0_81, %c0_82] : memref<4x8x8xf32, #tpu.memory_space<vmem>>, vector<1x8x8xf32>
      %150 = vector.shape_cast %149 : vector<1x8x8xf32> to vector<8x8xf32>
      %151 = vector.shape_cast %148 : vector<8x8xf32> to vector<1x8x8xf32>
      tpu.vector_store %arg19[%c2_80, %c0_81, %c0_82], %151 {strides = array<i32>} : memref<4x8x8xf32, #tpu.memory_space<vmem>>, vector<1x8x8xf32>,
      %152 = vector.extract_strided_slice %127 {offsets = [0, 24], sizes = [8, 8], strides = [1, 1]} : vector<8x64xf32> to vector<8x8xf32>
      %c3 = arith.constant 3 : index
      %c0_83 = arith.constant 0 : index
      %c0_84 = arith.constant 0 : index
      %153 = vector.load %arg18[%c3, %c0_83, %c0_84] : memref<4x8x8xf32, #tpu.memory_space<vmem>>, vector<1x8x8xf32>
      %154 = vector.shape_cast %153 : vector<1x8x8xf32> to vector<8x8xf32>
      %155 = vector.shape_cast %152 : vector<8x8xf32> to vector<1x8x8xf32>
      tpu.vector_store %arg18[%c3, %c0_83, %c0_84], %155 {strides = array<i32>} : memref<4x8x8xf32, #tpu.memory_space<vmem>>, vector<1x8x8xf32>,
      %156 = vector.extract_strided_slice %127 {offsets = [0, 56], sizes = [8, 8], strides = [1, 1]} : vector<8x64xf32> to vector<8x8xf32>
      %c3_85 = arith.constant 3 : index
      %c0_86 = arith.constant 0 : index
      %c0_87 = arith.constant 0 : index
      %157 = vector.load %arg19[%c3_85, %c0_86, %c0_87] : memref<4x8x8xf32, #tpu.memory_space<vmem>>, vector<1x8x8xf32>
      %158 = vector.shape_cast %157 : vector<1x8x8xf32> to vector<8x8xf32>
      %159 = vector.shape_cast %156 : vector<8x8xf32> to vector<1x8x8xf32>
      tpu.vector_store %arg19[%c3_85, %c0_86, %c0_87], %159 {strides = array<i32>} : memref<4x8x8xf32, #tpu.memory_space<vmem>>, vector<1x8x8xf32>,
    } else {
    }
    %c0_3 = arith.constant 0 : index
    %c0_4 = arith.constant 0 : index
    %c0_5 = arith.constant 0 : index
    %5 = vector.load %arg4[%c0_3, %c0_4, %c0_5] : memref<1x1x8xf32, #tpu.memory_space<vmem>>, vector<1x1x8xf32>
    %cst = arith.constant 1.000000e+00 : f32
    %6 = vector.broadcast %cst : f32 to vector<1x1x8xf32>
    %7 = arith.subf %5, %6 : vector<1x1x8xf32>
    %cst_6 = arith.constant 1.000000e+09 : f32
    %8 = vector.broadcast %cst_6 : f32 to vector<1x1x8xf32>
    %9 = arith.mulf %7, %8 : vector<1x1x8xf32>
    %c0_7 = arith.constant 0 : index
    %c0_8 = arith.constant 0 : index
    %10 = vector.load %arg5[%c0_7, %c0_8] : memref<32x96xf32, #tpu.memory_space<vmem>>, vector<32x32xf32>
    %cst_9 = arith.constant dense<0.000000e+00> : vector<8x32xf32>
    %11 = tpu.matmul %1, %10, %cst_9 {dimension_numbers = #tpu.dot_dimension_numbers<[1], [0], [0], [1], [0, 0, 1, 1], [], []>} : vector<8x32xf32>, vector<32x32xf32>, vector<8x32xf32> -> vector<8x32xf32>
    %c0_10 = arith.constant 0 : index
    %c0_11 = arith.constant 0 : index
    %12 = vector.load %arg6[%c0_10, %c0_11] : memref<1x96xf32, #tpu.memory_space<vmem>>, vector<1x32xf32>
    %13 = vector.broadcast %12 : vector<1x32xf32> to vector<8x32xf32>
    %14 = arith.addf %11, %13 : vector<8x32xf32>
    %cst_12 = arith.constant 0.353553385 : f32
    %15 = vector.broadcast %cst_12 : f32 to vector<8x32xf32>
    %16 = arith.mulf %14, %15 : vector<8x32xf32>
    %17 = vector.extract_strided_slice %16 {offsets = [0, 0], sizes = [8, 8], strides = [1, 1]} : vector<8x32xf32> to vector<8x8xf32>
    %18 = vector.extract_strided_slice %16 {offsets = [0, 8], sizes = [8, 8], strides = [1, 1]} : vector<8x32xf32> to vector<8x8xf32>
    %19 = vector.extract_strided_slice %16 {offsets = [0, 16], sizes = [8, 8], strides = [1, 1]} : vector<8x32xf32> to vector<8x8xf32>
    %20 = vector.extract_strided_slice %16 {offsets = [0, 24], sizes = [8, 8], strides = [1, 1]} : vector<8x32xf32> to vector<8x8xf32>
    %21 = vector.shape_cast %17 : vector<8x8xf32> to vector<1x8x8xf32>
    %22 = vector.shape_cast %18 : vector<8x8xf32> to vector<1x8x8xf32>
    %23 = vector.shape_cast %19 : vector<8x8xf32> to vector<1x8x8xf32>
    %24 = vector.shape_cast %20 : vector<8x8xf32> to vector<1x8x8xf32>
    %25 = tpu.concatenate %21, %22, %23, %24 in 0 : vector<1x8x8xf32>, vector<1x8x8xf32>, vector<1x8x8xf32>, vector<1x8x8xf32> -> vector<4x8x8xf32>
    %c0_13 = arith.constant 0 : index
    %c0_14 = arith.constant 0 : index
    %c0_15 = arith.constant 0 : index
    %26 = vector.load %arg18[%c0_13, %c0_14, %c0_15] : memref<4x8x8xf32, #tpu.memory_space<vmem>>, vector<4x8x8xf32>
    %c0_16 = arith.constant 0 : index
    %c0_17 = arith.constant 0 : index
    %c0_18 = arith.constant 0 : index
    %27 = vector.load %arg19[%c0_16, %c0_17, %c0_18] : memref<4x8x8xf32, #tpu.memory_space<vmem>>, vector<4x8x8xf32>
    "tpu.trace_start"() <{level = 10 : i32, message = "hqd,hkd->hqk"}> : () -> ()
    %cst_19 = arith.constant dense<0.000000e+00> : vector<4x8x8xf32>
    %28 = tpu.matmul %25, %26, %cst_19 {dimension_numbers = #tpu.dot_dimension_numbers<[2], [2], [1], [1], [0, 0, 0, 1, 1, 1], [0], [0]>} : vector<4x8x8xf32>, vector<4x8x8xf32>, vector<4x8x8xf32> -> vector<4x8x8xf32>
    "tpu.trace_stop"() : () -> ()
    %29 = vector.broadcast %9 : vector<1x1x8xf32> to vector<4x8x8xf32>
    %30 = arith.addf %28, %29 : vector<4x8x8xf32>
    %cst_20 = arith.constant dense<0xFF800000> : vector<4x8xf32>
    %31 = vector.multi_reduction <maximumf>, %30, %cst_20 [2] : vector<4x8x8xf32> to vector<4x8xf32>
    %32 = vector.shape_cast %31 : vector<4x8xf32> to vector<4x8x1xf32>
    %33 = vector.broadcast %32 : vector<4x8x1xf32> to vector<4x8x8xf32>
    %34 = arith.subf %30, %33 : vector<4x8x8xf32>
    %35 = math.exp %34 : vector<4x8x8xf32>
    %cst_21 = arith.constant dense<0.000000e+00> : vector<4x8xf32>
    %36 = vector.multi_reduction <add>, %35, %cst_21 [2] : vector<4x8x8xf32> to vector<4x8xf32>
    %37 = vector.shape_cast %36 : vector<4x8xf32> to vector<4x8x1xf32>
    %38 = tpu.reciprocal %37 {approx = true} : vector<4x8x1xf32> -> vector<4x8x1xf32>
    %39 = vector.broadcast %38 : vector<4x8x1xf32> to vector<4x8x8xf32>
    %40 = arith.mulf %35, %39 : vector<4x8x8xf32>
    "tpu.trace_start"() <{level = 10 : i32, message = "hqk,hkd->hqd"}> : () -> ()
    %cst_22 = arith.constant dense<0.000000e+00> : vector<4x8x8xf32>
    %41 = tpu.matmul %40, %27, %cst_22 {dimension_numbers = #tpu.dot_dimension_numbers<[2], [1], [1], [2], [0, 0, 0, 1, 1, 2], [0], [0]>} : vector<4x8x8xf32>, vector<4x8x8xf32>, vector<4x8x8xf32> -> vector<4x8x8xf32>
    "tpu.trace_stop"() : () -> ()
    %42 = vector.extract_strided_slice %41 {offsets = [0, 0, 0], sizes = [1, 8, 8], strides = [1, 1, 1]} : vector<4x8x8xf32> to vector<1x8x8xf32>
    %43 = vector.shape_cast %42 : vector<1x8x8xf32> to vector<8x8xf32>
    %44 = vector.extract_strided_slice %41 {offsets = [1, 0, 0], sizes = [1, 8, 8], strides = [1, 1, 1]} : vector<4x8x8xf32> to vector<1x8x8xf32>
    %45 = vector.shape_cast %44 : vector<1x8x8xf32> to vector<8x8xf32>
    %46 = vector.extract_strided_slice %41 {offsets = [2, 0, 0], sizes = [1, 8, 8], strides = [1, 1, 1]} : vector<4x8x8xf32> to vector<1x8x8xf32>
    %47 = vector.shape_cast %46 : vector<1x8x8xf32> to vector<8x8xf32>
    %48 = vector.extract_strided_slice %41 {offsets = [3, 0, 0], sizes = [1, 8, 8], strides = [1, 1, 1]} : vector<4x8x8xf32> to vector<1x8x8xf32>
    %49 = vector.shape_cast %48 : vector<1x8x8xf32> to vector<8x8xf32>
    %50 = tpu.concatenate %43, %45, %47, %49 in 1 : vector<8x8xf32>, vector<8x8xf32>, vector<8x8xf32>, vector<8x8xf32> -> vector<8x32xf32>
    %c0_23 = arith.constant 0 : index
    %c0_24 = arith.constant 0 : index
    %51 = vector.load %arg7[%c0_23, %c0_24] : memref<32x32xf32, #tpu.memory_space<vmem>>, vector<32x32xf32>
    %cst_25 = arith.constant dense<0.000000e+00> : vector<8x32xf32>
    %52 = tpu.matmul %50, %51, %cst_25 {dimension_numbers = #tpu.dot_dimension_numbers<[1], [0], [0], [1], [0, 0, 1, 1], [], []>} : vector<8x32xf32>, vector<32x32xf32>, vector<8x32xf32> -> vector<8x32xf32>
    %c0_26 = arith.constant 0 : index
    %c0_27 = arith.constant 0 : index
    %53 = vector.load %arg8[%c0_26, %c0_27] : memref<1x32xf32, #tpu.memory_space<vmem>>, vector<1x32xf32>
    %54 = vector.broadcast %53 : vector<1x32xf32> to vector<8x32xf32>
    %55 = arith.addf %52, %54 : vector<8x32xf32>
    %56 = arith.addf %1, %55 : vector<8x32xf32>
    %cst_28 = arith.constant dense<0.000000e+00> : vector<8xf32>
    %57 = vector.multi_reduction <add>, %56, %cst_28 [1] : vector<8x32xf32> to vector<8xf32>
    %58 = vector.shape_cast %57 : vector<8xf32> to vector<8x1xf32>
    %cst_29 = arith.constant 3.200000e+01 : f32
    %59 = vector.broadcast %cst_29 : f32 to vector<8x1xf32>
    %60 = arith.divf %58, %59 : vector<8x1xf32>
    %61 = vector.broadcast %60 : vector<8x1xf32> to vector<8x32xf32>
    %62 = arith.subf %56, %61 : vector<8x32xf32>
    %63 = arith.mulf %62, %62 : vector<8x32xf32>
    %cst_30 = arith.constant dense<0.000000e+00> : vector<8xf32>
    %64 = vector.multi_reduction <add>, %63, %cst_30 [1] : vector<8x32xf32> to vector<8xf32>
    %65 = vector.shape_cast %64 : vector<8xf32> to vector<8x1xf32>
    %cst_31 = arith.constant 3.200000e+01 : f32
    %66 = vector.broadcast %cst_31 : f32 to vector<8x1xf32>
    %67 = arith.divf %65, %66 : vector<8x1xf32>
    %68 = vector.broadcast %60 : vector<8x1xf32> to vector<8x32xf32>
    %69 = arith.subf %56, %68 : vector<8x32xf32>
    %cst_32 = arith.constant 9.99999974E-6 : f32
    %70 = vector.broadcast %cst_32 : f32 to vector<8x1xf32>
    %71 = arith.addf %67, %70 : vector<8x1xf32>
    %72 = math.rsqrt %71 : vector<8x1xf32>
    %73 = vector.broadcast %72 : vector<8x1xf32> to vector<8x32xf32>
    %74 = arith.mulf %69, %73 : vector<8x32xf32>
    %c0_33 = arith.constant 0 : index
    %c0_34 = arith.constant 0 : index
    %75 = vector.load %arg9[%c0_33, %c0_34] : memref<1x32xf32, #tpu.memory_space<vmem>>, vector<1x32xf32>
    %76 = vector.broadcast %75 : vector<1x32xf32> to vector<8x32xf32>
    %77 = arith.mulf %74, %76 : vector<8x32xf32>
    %c0_35 = arith.constant 0 : index
    %c0_36 = arith.constant 0 : index
    %78 = vector.load %arg10[%c0_35, %c0_36] : memref<1x32xf32, #tpu.memory_space<vmem>>, vector<1x32xf32>
    %79 = vector.broadcast %78 : vector<1x32xf32> to vector<8x32xf32>
    %80 = arith.addf %77, %79 : vector<8x32xf32>
    %c0_37 = arith.constant 0 : index
    %c0_38 = arith.constant 0 : index
    %81 = vector.load %arg11[%c0_37, %c0_38] : memref<32x64xf32, #tpu.memory_space<vmem>>, vector<32x64xf32>
    %cst_39 = arith.constant dense<0.000000e+00> : vector<8x64xf32>
    %82 = tpu.matmul %80, %81, %cst_39 {dimension_numbers = #tpu.dot_dimension_numbers<[1], [0], [0], [1], [0, 0, 1, 1], [], []>} : vector<8x32xf32>, vector<32x64xf32>, vector<8x64xf32> -> vector<8x64xf32>
    %c0_40 = arith.constant 0 : index
    %c0_41 = arith.constant 0 : index
    %83 = vector.load %arg12[%c0_40, %c0_41] : memref<1x64xf32, #tpu.memory_space<vmem>>, vector<1x64xf32>
    %84 = vector.broadcast %83 : vector<1x64xf32> to vector<8x64xf32>
    %85 = arith.addf %82, %84 : vector<8x64xf32>
    %cst_42 = arith.constant 0.000000e+00 : f32
    %86 = vector.broadcast %cst_42 : f32 to vector<8x64xf32>
    %87 = arith.maximumf %85, %86 : vector<8x64xf32>
    %c0_43 = arith.constant 0 : index
    %c0_44 = arith.constant 0 : index
    %88 = vector.load %arg13[%c0_43, %c0_44] : memref<64x32xf32, #tpu.memory_space<vmem>>, vector<64x32xf32>
    %cst_45 = arith.constant dense<0.000000e+00> : vector<8x32xf32>
    %89 = tpu.matmul %87, %88, %cst_45 {dimension_numbers = #tpu.dot_dimension_numbers<[1], [0], [0], [1], [0, 0, 1, 1], [], []>} : vector<8x64xf32>, vector<64x32xf32>, vector<8x32xf32> -> vector<8x32xf32>
    %c0_46 = arith.constant 0 : index
    %c0_47 = arith.constant 0 : index
    %90 = vector.load %arg14[%c0_46, %c0_47] : memref<1x32xf32, #tpu.memory_space<vmem>>, vector<1x32xf32>
    %91 = vector.broadcast %90 : vector<1x32xf32> to vector<8x32xf32>
    %92 = arith.addf %89, %91 : vector<8x32xf32>
    %93 = arith.addf %80, %92 : vector<8x32xf32>
    %cst_48 = arith.constant dense<0.000000e+00> : vector<8xf32>
    %94 = vector.multi_reduction <add>, %93, %cst_48 [1] : vector<8x32xf32> to vector<8xf32>
    %95 = vector.shape_cast %94 : vector<8xf32> to vector<8x1xf32>
    %cst_49 = arith.constant 3.200000e+01 : f32
    %96 = vector.broadcast %cst_49 : f32 to vector<8x1xf32>
    %97 = arith.divf %95, %96 : vector<8x1xf32>
    %98 = vector.broadcast %97 : vector<8x1xf32> to vector<8x32xf32>
    %99 = arith.subf %93, %98 : vector<8x32xf32>
    %100 = arith.mulf %99, %99 : vector<8x32xf32>
    %cst_50 = arith.constant dense<0.000000e+00> : vector<8xf32>
    %101 = vector.multi_reduction <add>, %100, %cst_50 [1] : vector<8x32xf32> to vector<8xf32>
    %102 = vector.shape_cast %101 : vector<8xf32> to vector<8x1xf32>
    %cst_51 = arith.constant 3.200000e+01 : f32
    %103 = vector.broadcast %cst_51 : f32 to vector<8x1xf32>
    %104 = arith.divf %102, %103 : vector<8x1xf32>
    %105 = vector.broadcast %97 : vector<8x1xf32> to vector<8x32xf32>
    %106 = arith.subf %93, %105 : vector<8x32xf32>
    %cst_52 = arith.constant 9.99999974E-6 : f32
    %107 = vector.broadcast %cst_52 : f32 to vector<8x1xf32>
    %108 = arith.addf %104, %107 : vector<8x1xf32>
    %109 = math.rsqrt %108 : vector<8x1xf32>
    %110 = vector.broadcast %109 : vector<8x1xf32> to vector<8x32xf32>
    %111 = arith.mulf %106, %110 : vector<8x32xf32>
    %c0_53 = arith.constant 0 : index
    %c0_54 = arith.constant 0 : index
    %112 = vector.load %arg15[%c0_53, %c0_54] : memref<1x32xf32, #tpu.memory_space<vmem>>, vector<1x32xf32>
    %113 = vector.broadcast %112 : vector<1x32xf32> to vector<8x32xf32>
    %114 = arith.mulf %111, %113 : vector<8x32xf32>
    %c0_55 = arith.constant 0 : index
    %c0_56 = arith.constant 0 : index
    %115 = vector.load %arg16[%c0_55, %c0_56] : memref<1x32xf32, #tpu.memory_space<vmem>>, vector<1x32xf32>
    %116 = vector.broadcast %115 : vector<1x32xf32> to vector<8x32xf32>
    %117 = arith.addf %114, %116 : vector<8x32xf32>
    %c0_57 = arith.constant 0 : index
    %c0_58 = arith.constant 0 : index
    %c0_59 = arith.constant 0 : index
    %118 = vector.load %arg17[%c0_57, %c0_58, %c0_59] : memref<1x8x32xf32, #tpu.memory_space<vmem>>, vector<1x8x32xf32>
    %119 = vector.shape_cast %118 : vector<1x8x32xf32> to vector<8x32xf32>
    %120 = vector.shape_cast %117 : vector<8x32xf32> to vector<1x8x32xf32>
    tpu.vector_store %arg17[%c0_57, %c0_58, %c0_59], %120 {strides = array<i32>} : memref<1x8x32xf32, #tpu.memory_space<vmem>>, vector<1x8x32xf32>,
    return
  }
  func.func @transform_0(%arg0: i32, %arg1: i32) -> (i32, i32, i32) {
    %c0_i32 = arith.constant 0 : i32
    %c0_i32_0 = arith.constant 0 : i32
    return %arg0, %arg1, %c0_i32 : i32, i32, i32
  }
  func.func @transform_1(%arg0: i32, %arg1: i32) -> (i32, i32, i32) {
    %c0_i32 = arith.constant 0 : i32
    %c0_i32_0 = arith.constant 0 : i32
    %c0_i32_1 = arith.constant 0 : i32
    return %arg0, %c0_i32, %c0_i32_0 : i32, i32, i32
  }
  func.func @transform_2(%arg0: i32, %arg1: i32) -> (i32, i32, i32) {
    %c0_i32 = arith.constant 0 : i32
    %c0_i32_0 = arith.constant 0 : i32
    %c0_i32_1 = arith.constant 0 : i32
    return %arg0, %c0_i32, %c0_i32_0 : i32, i32, i32
  }
  func.func @transform_3(%arg0: i32, %arg1: i32) -> (i32, i32) {
    %c0_i32 = arith.constant 0 : i32
    %c0_i32_0 = arith.constant 0 : i32
    %c0_i32_1 = arith.constant 0 : i32
    return %c0_i32, %c0_i32_0 : i32, i32
  }
  func.func @transform_4(%arg0: i32, %arg1: i32) -> (i32, i32) {
    %c0_i32 = arith.constant 0 : i32
    %c0_i32_0 = arith.constant 0 : i32
    %c0_i32_1 = arith.constant 0 : i32
    return %c0_i32, %c0_i32_0 : i32, i32
  }
  func.func @transform_5(%arg0: i32, %arg1: i32) -> (i32, i32) {
    %c0_i32 = arith.constant 0 : i32
    %c0_i32_0 = arith.constant 0 : i32
    %c0_i32_1 = arith.constant 0 : i32
    return %c0_i32, %c0_i32_0 : i32, i32
  }
  func.func @transform_6(%arg0: i32, %arg1: i32) -> (i32, i32) {
    %c0_i32 = arith.constant 0 : i32
    %c0_i32_0 = arith.constant 0 : i32
    %c0_i32_1 = arith.constant 0 : i32
    return %c0_i32, %c0_i32_0 : i32, i32
  }
  func.func @transform_7(%arg0: i32, %arg1: i32) -> (i32, i32) {
    %c0_i32 = arith.constant 0 : i32
    %c0_i32_0 = arith.constant 0 : i32
    %c0_i32_1 = arith.constant 0 : i32
    return %c0_i32, %c0_i32_0 : i32, i32
  }
  func.func @transform_8(%arg0: i32, %arg1: i32) -> (i32, i32) {
    %c0_i32 = arith.constant 0 : i32
    %c0_i32_0 = arith.constant 0 : i32
    %c0_i32_1 = arith.constant 0 : i32
    return %c0_i32, %c0_i32_0 : i32, i32
  }
  func.func @transform_9(%arg0: i32, %arg1: i32) -> (i32, i32) {
    %c0_i32 = arith.constant 0 : i32
    %c0_i32_0 = arith.constant 0 : i32
    %c0_i32_1 = arith.constant 0 : i32
    return %c0_i32, %c0_i32_0 : i32, i32
  }
  func.func @transform_10(%arg0: i32, %arg1: i32) -> (i32, i32) {
    %c0_i32 = arith.constant 0 : i32
    %c0_i32_0 = arith.constant 0 : i32
    %c0_i32_1 = arith.constant 0 : i32
    return %c0_i32, %c0_i32_0 : i32, i32
  }
  func.func @transform_11(%arg0: i32, %arg1: i32) -> (i32, i32) {
    %c0_i32 = arith.constant 0 : i32
    %c0_i32_0 = arith.constant 0 : i32
    %c0_i32_1 = arith.constant 0 : i32
    return %c0_i32, %c0_i32_0 : i32, i32
  }
  func.func @transform_12(%arg0: i32, %arg1: i32) -> (i32, i32) {
    %c0_i32 = arith.constant 0 : i32
    %c0_i32_0 = arith.constant 0 : i32
    %c0_i32_1 = arith.constant 0 : i32
    return %c0_i32, %c0_i32_0 : i32, i32
  }
  func.func @transform_13(%arg0: i32, %arg1: i32) -> (i32, i32) {
    %c0_i32 = arith.constant 0 : i32
    %c0_i32_0 = arith.constant 0 : i32
    %c0_i32_1 = arith.constant 0 : i32
    return %c0_i32, %c0_i32_0 : i32, i32
  }
  func.func @transform_14(%arg0: i32, %arg1: i32) -> (i32, i32) {
    %c0_i32 = arith.constant 0 : i32
    %c0_i32_0 = arith.constant 0 : i32
    %c0_i32_1 = arith.constant 0 : i32
    return %c0_i32, %c0_i32_0 : i32, i32
  }
  func.func @transform_15(%arg0: i32, %arg1: i32) -> (i32, i32, i32) {
    %c0_i32 = arith.constant 0 : i32
    %c0_i32_0 = arith.constant 0 : i32
    return %arg0, %arg1, %c0_i32 : i32, i32, i32
  }
}

module attributes {stable_mosaic.version = 11 : i64} {
  func.func @encoder_layer_kernel(%arg0: i32, %arg1: i32, %arg2: memref<1x8x32xf32, #tpu.memory_space<vmem>>, %arg3: memref<1x8x32xf32, #tpu.memory_space<vmem>>, %arg4: memref<1x1x8xf32, #tpu.memory_space<vmem>>, %arg5: memref<32x96xf32, #tpu.memory_space<vmem>>, %arg6: memref<1x96xf32, #tpu.memory_space<vmem>>, %arg7: memref<32x32xf32, #tpu.memory_space<vmem>>, %arg8: memref<1x32xf32, #tpu.memory_space<vmem>>, %arg9: memref<1x32xf32, #tpu.memory_space<vmem>>, %arg10: memref<1x32xf32, #tpu.memory_space<vmem>>, %arg11: memref<32x64xf32, #tpu.memory_space<vmem>>, %arg12: memref<1x64xf32, #tpu.memory_space<vmem>>, %arg13: memref<64x32xf32, #tpu.memory_space<vmem>>, %arg14: memref<1x32xf32, #tpu.memory_space<vmem>>, %arg15: memref<1x32xf32, #tpu.memory_space<vmem>>, %arg16: memref<1x32xf32, #tpu.memory_space<vmem>>, %arg17: memref<1x8x32xf32, #tpu.memory_space<vmem>>, %arg18: memref<4x8x8xf32, #tpu.memory_space<vmem>>, %arg19: memref<4x8x8xf32, #tpu.memory_space<vmem>>) attributes {dimension_semantics = [#tpu.dimension_semantics<parallel>, #tpu.dimension_semantics<arbitrary>], iteration_bounds = array<i64: 2, 1>, scalar_prefetch = 0 : i64, scratch_operands = 2 : i64, tpu.core_type = #tpu.core_type<tc>, window_params = [{transform_indices = @transform_0, window_bounds = array<i64: 1, 8, 32>}, {transform_indices = @transform_1, window_bounds = array<i64: 1, 8, 32>}, {transform_indices = @transform_2, window_bounds = array<i64: 1, 1, 8>}, {pipeline_mode = #tpu.pipeline_mode<synchronous>, transform_indices = @transform_3, window_bounds = array<i64: 32, 96>}, {pipeline_mode = #tpu.pipeline_mode<synchronous>, transform_indices = @transform_4, window_bounds = array<i64: 1, 96>}, {pipeline_mode = #tpu.pipeline_mode<synchronous>, transform_indices = @transform_5, window_bounds = array<i64: 32, 32>}, {pipeline_mode = #tpu.pipeline_mode<synchronous>, transform_indices = @transform_6, window_bounds = array<i64: 1, 32>}, {pipeline_mode = #tpu.pipeline_mode<synchronous>, transform_indices = @transform_7, window_bounds = array<i64: 1, 32>}, {pipeline_mode = #tpu.pipeline_mode<synchronous>, transform_indices = @transform_8, window_bounds = array<i64: 1, 32>}, {pipeline_mode = #tpu.pipeline_mode<synchronous>, transform_indices = @transform_9, window_bounds = array<i64: 32, 64>}, {pipeline_mode = #tpu.pipeline_mode<synchronous>, transform_indices = @transform_10, window_bounds = array<i64: 1, 64>}, {pipeline_mode = #tpu.pipeline_mode<synchronous>, transform_indices = @transform_11, window_bounds = array<i64: 64, 32>}, {pipeline_mode = #tpu.pipeline_mode<synchronous>, transform_indices = @transform_12, window_bounds = array<i64: 1, 32>}, {pipeline_mode = #tpu.pipeline_mode<synchronous>, transform_indices = @transform_13, window_bounds = array<i64: 1, 32>}, {pipeline_mode = #tpu.pipeline_mode<synchronous>, transform_indices = @transform_14, window_bounds = array<i64: 1, 32>}, {transform_indices = @transform_15, window_bounds = array<i64: 1, 8, 32>}]} {
    %c0 = arith.constant 0 : index
    %c0_0 = arith.constant 0 : index
    %c0_1 = arith.constant 0 : index
    %0 = vector.load %arg2[%c0, %c0_0, %c0_1] : memref<1x8x32xf32, #tpu.memory_space<vmem>>, vector<1x8x32xf32>
    %1 = vector.shape_cast %0 : vector<1x8x32xf32> to vector<8x32xf32>
    %c0_i32 = arith.constant 0 : i32
    %2 = arith.cmpi eq, %arg1, %c0_i32 : i32
    %3 = arith.extui %2 : i1 to i32
    %c0_i32_2 = arith.constant 0 : i32
    %4 = arith.cmpi ne, %3, %c0_i32_2 : i32
    scf.if %4 {
      %c0_60 = arith.constant 0 : index
      %c0_61 = arith.constant 0 : index
      %c0_62 = arith.constant 0 : index
      %121 = vector.load %arg3[%c0_60, %c0_61, %c0_62] : memref<1x8x32xf32, #tpu.memory_space<vmem>>, vector<1x8x32xf32>
      %122 = vector.shape_cast %121 : vector<1x8x32xf32> to vector<8x32xf32>
      %c0_63 = arith.constant 0 : index
      %c32 = arith.constant 32 : index
      %123 = vector.load %arg5[%c0_63, %c32] : memref<32x96xf32, #tpu.memory_space<vmem>>, vector<32x64xf32>
      %cst_64 = arith.constant dense<0.000000e+00> : vector<8x64xf32>
      %124 = tpu.matmul %122, %123, %cst_64 {dimension_numbers = #tpu.dot_dimension_numbers<[1], [0], [0], [1], [0, 0, 1, 1], [], []>} : vector<8x32xf32>, vector<32x64xf32>, vector<8x64xf32> -> vector<8x64xf32>
      %c0_65 = arith.constant 0 : index
      %c32_66 = arith.constant 32 : index
      %125 = vector.load %arg6[%c0_65, %c32_66] : memref<1x96xf32, #tpu.memory_space<vmem>>, vector<1x64xf32>
      %126 = vector.broadcast %125 : vector<1x64xf32> to vector<8x64xf32>
      %127 = arith.addf %124, %126 : vector<8x64xf32>
      %128 = vector.extract_strided_slice %127 {offsets = [0, 0], sizes = [8, 8], strides = [1, 1]} : vector<8x64xf32> to vector<8x8xf32>
      %c0_67 = arith.constant 0 : index
      %c0_68 = arith.constant 0 : index
      %c0_69 = arith.constant 0 : index
      %129 = vector.load %arg18[%c0_67, %c0_68, %c0_69] : memref<4x8x8xf32, #tpu.memory_space<vmem>>, vector<1x8x8xf32>
      %130 = vector.shape_cast %129 : vector<1x8x8xf32> to vector<8x8xf32>
      %131 = vector.shape_cast %128 : vector<8x8xf32> to vector<1x8x8xf32>
      tpu.vector_store %arg18[%c0_67, %c0_68, %c0_69], %131 {strides = array<i32>} : memref<4x8x8xf32, #tpu.memory_space<vmem>>, vector<1x8x8xf32>,
      %132 = vector.extract_strided_slice %127 {offsets = [0, 32], sizes = [8, 8], strides = [1, 1]} : vector<8x64xf32> to vector<8x8xf32>
      %c0_70 = arith.constant 0 : index
      %c0_71 = arith.constant 0 : index
      %c0_72 = arith.constant 0 : index
      %133 = vector.load %arg19[%c0_70, %c0_71, %c0_72] : memref<4x8x8xf32, #tpu.memory_space<vmem>>, vector<1x8x8xf32>
      %134 = vector.shape_cast %133 : vector<1x8x8xf32> to vector<8x8xf32>
      %135 = vector.shape_cast %132 : vector<8x8xf32> to vector<1x8x8xf32>
      tpu.vector_store %arg19[%c0_70, %c0_71, %c0_72], %135 {strides = array<i32>} : memref<4x8x8xf32, #tpu.memory_space<vmem>>, vector<1x8x8xf32>,
      %136 = vector.extract_strided_slice %127 {offsets = [0, 8], sizes = [8, 8], strides = [1, 1]} : vector<8x64xf32> to vector<8x8xf32>
      %c1 = arith.constant 1 : index
      %c0_73 = arith.constant 0 : index
      %c0_74 = arith.constant 0 : index
      %137 = vector.load %arg18[%c1, %c0_73, %c0_74] : memref<4x8x8xf32, #tpu.memory_space<vmem>>, vector<1x8x8xf32>
      %138 = vector.shape_cast %137 : vector<1x8x8xf32> to vector<8x8xf32>
      %139 = vector.shape_cast %136 : vector<8x8xf32> to vector<1x8x8xf32>
      tpu.vector_store %arg18[%c1, %c0_73, %c0_74], %139 {strides = array<i32>} : memref<4x8x8xf32, #tpu.memory_space<vmem>>, vector<1x8x8xf32>,
      %140 = vector.extract_strided_slice %127 {offsets = [0, 40], sizes = [8, 8], strides = [1, 1]} : vector<8x64xf32> to vector<8x8xf32>
      %c1_75 = arith.constant 1 : index
      %c0_76 = arith.constant 0 : index
      %c0_77 = arith.constant 0 : index
      %141 = vector.load %arg19[%c1_75, %c0_76, %c0_77] : memref<4x8x8xf32, #tpu.memory_space<vmem>>, vector<1x8x8xf32>
      %142 = vector.shape_cast %141 : vector<1x8x8xf32> to vector<8x8xf32>
      %143 = vector.shape_cast %140 : vector<8x8xf32> to vector<1x8x8xf32>
      tpu.vector_store %arg19[%c1_75, %c0_76, %c0_77], %143 {strides = array<i32>} : memref<4x8x8xf32, #tpu.memory_space<vmem>>, vector<1x8x8xf32>,
      %144 = vector.extract_strided_slice %127 {offsets = [0, 16], sizes = [8, 8], strides = [1, 1]} : vector<8x64xf32> to vector<8x8xf32>
      %c2 = arith.constant 2 : index
      %c0_78 = arith.constant 0 : index
      %c0_79 = arith.constant 0 : index
      %145 = vector.load %arg18[%c2, %c0_78, %c0_79] : memref<4x8x8xf32, #tpu.memory_space<vmem>>, vector<1x8x8xf32>
      %146 = vector.shape_cast %145 : vector<1x8x8xf32> to vector<8x8xf32>
      %147 = vector.shape_cast %144 : vector<8x8xf32> to vector<1x8x8xf32>
      tpu.vector_store %arg18[%c2, %c0_78, %c0_79], %147 {strides = array<i32>} : memref<4x8x8xf32, #tpu.memory_space<vmem>>, vector<1x8x8xf32>,
      %148 = vector.extract_strided_slice %127 {offsets = [0, 48], sizes = [8, 8], strides = [1, 1]} : vector<8x64xf32> to vector<8x8xf32>
      %c2_80 = arith.constant 2 : index
      %c0_81 = arith.constant 0 : index
      %c0_82 = arith.constant 0 : index
      %149 = vector.load %arg19[%c2_80, %c0_81, %c0_82] : memref<4x8x8xf32, #tpu.memory_space<vmem>>, vector<1x8x8xf32>
      %150 = vector.shape_cast %149 : vector<1x8x8xf32> to vector<8x8xf32>
      %151 = vector.shape_cast %148 : vector<8x8xf32> to vector<1x8x8xf32>
      tpu.vector_store %arg19[%c2_80, %c0_81, %c0_82], %151 {strides = array<i32>} : memref<4x8x8xf32, #tpu.memory_space<vmem>>, vector<1x8x8xf32>,
      %152 = vector.extract_strided_slice %127 {offsets = [0, 24], sizes = [8, 8], strides = [1, 1]} : vector<8x64xf32> to vector<8x8xf32>
      %c3 = arith.constant 3 : index
      %c0_83 = arith.constant 0 : index
      %c0_84 = arith.constant 0 : index
      %153 = vector.load %arg18[%c3, %c0_83, %c0_84] : memref<4x8x8xf32, #tpu.memory_space<vmem>>, vector<1x8x8xf32>
      %154 = vector.shape_cast %153 : vector<1x8x8xf32> to vector<8x8xf32>
      %155 = vector.shape_cast %152 : vector<8x8xf32> to vector<1x8x8xf32>
      tpu.vector_store %arg18[%c3, %c0_83, %c0_84], %155 {strides = array<i32>} : memref<4x8x8xf32, #tpu.memory_space<vmem>>, vector<1x8x8xf32>,
      %156 = vector.extract_strided_slice %127 {offsets = [0, 56], sizes = [8, 8], strides = [1, 1]} : vector<8x64xf32> to vector<8x8xf32>
      %c3_85 = arith.constant 3 : index
      %c0_86 = arith.constant 0 : index
      %c0_87 = arith.constant 0 : index
      %157 = vector.load %arg19[%c3_85, %c0_86, %c0_87] : memref<4x8x8xf32, #tpu.memory_space<vmem>>, vector<1x8x8xf32>
      %158 = vector.shape_cast %157 : vector<1x8x8xf32> to vector<8x8xf32>
      %159 = vector.shape_cast %156 : vector<8x8xf32> to vector<1x8x8xf32>
      tpu.vector_store %arg19[%c3_85, %c0_86, %c0_87], %159 {strides = array<i32>} : memref<4x8x8xf32, #tpu.memory_space<vmem>>, vector<1x8x8xf32>,
    } else {
    }
    %c0_3 = arith.constant 0 : index
    %c0_4 = arith.constant 0 : index
    %c0_5 = arith.constant 0 : index
    %5 = vector.load %arg4[%c0_3, %c0_4, %c0_5] : memref<1x1x8xf32, #tpu.memory_space<vmem>>, vector<1x1x8xf32>
    %cst = arith.constant 1.000000e+00 : f32
    %6 = vector.broadcast %cst : f32 to vector<1x1x8xf32>
    %7 = arith.subf %5, %6 : vector<1x1x8xf32>
    %cst_6 = arith.constant 1.000000e+09 : f32
    %8 = vector.broadcast %cst_6 : f32 to vector<1x1x8xf32>
    %9 = arith.mulf %7, %8 : vector<1x1x8xf32>
    %c0_7 = arith.constant 0 : index
    %c0_8 = arith.constant 0 : index
    %10 = vector.load %arg5[%c0_7, %c0_8] : memref<32x96xf32, #tpu.memory_space<vmem>>, vector<32x32xf32>
    %cst_9 = arith.constant dense<0.000000e+00> : vector<8x32xf32>
    %11 = tpu.matmul %1, %10, %cst_9 {dimension_numbers = #tpu.dot_dimension_numbers<[1], [0], [0], [1], [0, 0, 1, 1], [], []>} : vector<8x32xf32>, vector<32x32xf32>, vector<8x32xf32> -> vector<8x32xf32>
    %c0_10 = arith.constant 0 : index
    %c0_11 = arith.constant 0 : index
    %12 = vector.load %arg6[%c0_10, %c0_11] : memref<1x96xf32, #tpu.memory_space<vmem>>, vector<1x32xf32>
    %13 = vector.broadcast %12 : vector<1x32xf32> to vector<8x32xf32>
    %14 = arith.addf %11, %13 : vector<8x32xf32>
    %cst_12 = arith.constant 0.353553385 : f32
    %15 = vector.broadcast %cst_12 : f32 to vector<8x32xf32>
    %16 = arith.mulf %14, %15 : vector<8x32xf32>
    %17 = vector.extract_strided_slice %16 {offsets = [0, 0], sizes = [8, 8], strides = [1, 1]} : vector<8x32xf32> to vector<8x8xf32>
    %18 = vector.extract_strided_slice %16 {offsets = [0, 8], sizes = [8, 8], strides = [1, 1]} : vector<8x32xf32> to vector<8x8xf32>
    %19 = vector.extract_strided_slice %16 {offsets = [0, 16], sizes = [8, 8], strides = [1, 1]} : vector<8x32xf32> to vector<8x8xf32>
    %20 = vector.extract_strided_slice %16 {offsets = [0, 24], sizes = [8, 8], strides = [1, 1]} : vector<8x32xf32> to vector<8x8xf32>
    %21 = vector.shape_cast %17 : vector<8x8xf32> to vector<1x8x8xf32>
    %22 = vector.shape_cast %18 : vector<8x8xf32> to vector<1x8x8xf32>
    %23 = vector.shape_cast %19 : vector<8x8xf32> to vector<1x8x8xf32>
    %24 = vector.shape_cast %20 : vector<8x8xf32> to vector<1x8x8xf32>
    %25 = tpu.concatenate %21, %22, %23, %24 in 0 : vector<1x8x8xf32>, vector<1x8x8xf32>, vector<1x8x8xf32>, vector<1x8x8xf32> -> vector<4x8x8xf32>
    %c0_13 = arith.constant 0 : index
    %c0_14 = arith.constant 0 : index
    %c0_15 = arith.constant 0 : index
    %26 = vector.load %arg18[%c0_13, %c0_14, %c0_15] : memref<4x8x8xf32, #tpu.memory_space<vmem>>, vector<4x8x8xf32>
    %c0_16 = arith.constant 0 : index
    %c0_17 = arith.constant 0 : index
    %c0_18 = arith.constant 0 : index
    %27 = vector.load %arg19[%c0_16, %c0_17, %c0_18] : memref<4x8x8xf32, #tpu.memory_space<vmem>>, vector<4x8x8xf32>
    "tpu.trace_start"() <{level = 10 : i32, message = "hqd,hkd->hqk"}> : () -> ()
    %cst_19 = arith.constant dense<0.000000e+00> : vector<4x8x8xf32>
    %28 = tpu.matmul %25, %26, %cst_19 {dimension_numbers = #tpu.dot_dimension_numbers<[2], [2], [1], [1], [0, 0, 0, 1, 1, 1], [0], [0]>} : vector<4x8x8xf32>, vector<4x8x8xf32>, vector<4x8x8xf32> -> vector<4x8x8xf32>
    "tpu.trace_stop"() : () -> ()
    %29 = vector.broadcast %9 : vector<1x1x8xf32> to vector<4x8x8xf32>
    %30 = arith.addf %28, %29 : vector<4x8x8xf32>
    %cst_20 = arith.constant dense<0xFF800000> : vector<4x8xf32>
    %31 = vector.multi_reduction <maximumf>, %30, %cst_20 [2] : vector<4x8x8xf32> to vector<4x8xf32>
    %32 = vector.shape_cast %31 : vector<4x8xf32> to vector<4x8x1xf32>
    %33 = vector.broadcast %32 : vector<4x8x1xf32> to vector<4x8x8xf32>
    %34 = arith.subf %30, %33 : vector<4x8x8xf32>
    %35 = math.exp %34 : vector<4x8x8xf32>
    %cst_21 = arith.constant dense<0.000000e+00> : vector<4x8xf32>
    %36 = vector.multi_reduction <add>, %35, %cst_21 [2] : vector<4x8x8xf32> to vector<4x8xf32>
    %37 = vector.shape_cast %36 : vector<4x8xf32> to vector<4x8x1xf32>
    %38 = tpu.reciprocal %37 {approx = true} : vector<4x8x1xf32> -> vector<4x8x1xf32>
    %39 = vector.broadcast %38 : vector<4x8x1xf32> to vector<4x8x8xf32>
    %40 = arith.mulf %35, %39 : vector<4x8x8xf32>
    "tpu.trace_start"() <{level = 10 : i32, message = "hqk,hkd->hqd"}> : () -> ()
    %cst_22 = arith.constant dense<0.000000e+00> : vector<4x8x8xf32>
    %41 = tpu.matmul %40, %27, %cst_22 {dimension_numbers = #tpu.dot_dimension_numbers<[2], [1], [1], [2], [0, 0, 0, 1, 1, 2], [0], [0]>} : vector<4x8x8xf32>, vector<4x8x8xf32>, vector<4x8x8xf32> -> vector<4x8x8xf32>
    "tpu.trace_stop"() : () -> ()
    %42 = vector.extract_strided_slice %41 {offsets = [0, 0, 0], sizes = [1, 8, 8], strides = [1, 1, 1]} : vector<4x8x8xf32> to vector<1x8x8xf32>
    %43 = vector.shape_cast %42 : vector<1x8x8xf32> to vector<8x8xf32>
    %44 = vector.extract_strided_slice %41 {offsets = [1, 0, 0], sizes = [1, 8, 8], strides = [1, 1, 1]} : vector<4x8x8xf32> to vector<1x8x8xf32>
    %45 = vector.shape_cast %44 : vector<1x8x8xf32> to vector<8x8xf32>
    %46 = vector.extract_strided_slice %41 {offsets = [2, 0, 0], sizes = [1, 8, 8], strides = [1, 1, 1]} : vector<4x8x8xf32> to vector<1x8x8xf32>
    %47 = vector.shape_cast %46 : vector<1x8x8xf32> to vector<8x8xf32>
    %48 = vector.extract_strided_slice %41 {offsets = [3, 0, 0], sizes = [1, 8, 8], strides = [1, 1, 1]} : vector<4x8x8xf32> to vector<1x8x8xf32>
    %49 = vector.shape_cast %48 : vector<1x8x8xf32> to vector<8x8xf32>
    %50 = tpu.concatenate %43, %45, %47, %49 in 1 : vector<8x8xf32>, vector<8x8xf32>, vector<8x8xf32>, vector<8x8xf32> -> vector<8x32xf32>
    %c0_23 = arith.constant 0 : index
    %c0_24 = arith.constant 0 : index
    %51 = vector.load %arg7[%c0_23, %c0_24] : memref<32x32xf32, #tpu.memory_space<vmem>>, vector<32x32xf32>
    %cst_25 = arith.constant dense<0.000000e+00> : vector<8x32xf32>
    %52 = tpu.matmul %50, %51, %cst_25 {dimension_numbers = #tpu.dot_dimension_numbers<[1], [0], [0], [1], [0, 0, 1, 1], [], []>} : vector<8x32xf32>, vector<32x32xf32>, vector<8x32xf32> -> vector<8x32xf32>
    %c0_26 = arith.constant 0 : index
    %c0_27 = arith.constant 0 : index
    %53 = vector.load %arg8[%c0_26, %c0_27] : memref<1x32xf32, #tpu.memory_space<vmem>>, vector<1x32xf32>
    %54 = vector.broadcast %53 : vector<1x32xf32> to vector<8x32xf32>
    %55 = arith.addf %52, %54 : vector<8x32xf32>
    %56 = arith.addf %1, %55 : vector<8x32xf32>
    %cst_28 = arith.constant dense<0.000000e+00> : vector<8xf32>
    %57 = vector.multi_reduction <add>, %56, %cst_28 [1] : vector<8x32xf32> to vector<8xf32>
    %58 = vector.shape_cast %57 : vector<8xf32> to vector<8x1xf32>
    %cst_29 = arith.constant 3.200000e+01 : f32
    %59 = vector.broadcast %cst_29 : f32 to vector<8x1xf32>
    %60 = arith.divf %58, %59 : vector<8x1xf32>
    %61 = vector.broadcast %60 : vector<8x1xf32> to vector<8x32xf32>
    %62 = arith.subf %56, %61 : vector<8x32xf32>
    %63 = arith.mulf %62, %62 : vector<8x32xf32>
    %cst_30 = arith.constant dense<0.000000e+00> : vector<8xf32>
    %64 = vector.multi_reduction <add>, %63, %cst_30 [1] : vector<8x32xf32> to vector<8xf32>
    %65 = vector.shape_cast %64 : vector<8xf32> to vector<8x1xf32>
    %cst_31 = arith.constant 3.200000e+01 : f32
    %66 = vector.broadcast %cst_31 : f32 to vector<8x1xf32>
    %67 = arith.divf %65, %66 : vector<8x1xf32>
    %68 = vector.broadcast %60 : vector<8x1xf32> to vector<8x32xf32>
    %69 = arith.subf %56, %68 : vector<8x32xf32>
    %cst_32 = arith.constant 9.99999974E-6 : f32
    %70 = vector.broadcast %cst_32 : f32 to vector<8x1xf32>
    %71 = arith.addf %67, %70 : vector<8x1xf32>
    %72 = math.rsqrt %71 : vector<8x1xf32>
    %73 = vector.broadcast %72 : vector<8x1xf32> to vector<8x32xf32>
    %74 = arith.mulf %69, %73 : vector<8x32xf32>
    %c0_33 = arith.constant 0 : index
    %c0_34 = arith.constant 0 : index
    %75 = vector.load %arg9[%c0_33, %c0_34] : memref<1x32xf32, #tpu.memory_space<vmem>>, vector<1x32xf32>
    %76 = vector.broadcast %75 : vector<1x32xf32> to vector<8x32xf32>
    %77 = arith.mulf %74, %76 : vector<8x32xf32>
    %c0_35 = arith.constant 0 : index
    %c0_36 = arith.constant 0 : index
    %78 = vector.load %arg10[%c0_35, %c0_36] : memref<1x32xf32, #tpu.memory_space<vmem>>, vector<1x32xf32>
    %79 = vector.broadcast %78 : vector<1x32xf32> to vector<8x32xf32>
    %80 = arith.addf %77, %79 : vector<8x32xf32>
    %c0_37 = arith.constant 0 : index
    %c0_38 = arith.constant 0 : index
    %81 = vector.load %arg11[%c0_37, %c0_38] : memref<32x64xf32, #tpu.memory_space<vmem>>, vector<32x64xf32>
    %cst_39 = arith.constant dense<0.000000e+00> : vector<8x64xf32>
    %82 = tpu.matmul %80, %81, %cst_39 {dimension_numbers = #tpu.dot_dimension_numbers<[1], [0], [0], [1], [0, 0, 1, 1], [], []>} : vector<8x32xf32>, vector<32x64xf32>, vector<8x64xf32> -> vector<8x64xf32>
    %c0_40 = arith.constant 0 : index
    %c0_41 = arith.constant 0 : index
    %83 = vector.load %arg12[%c0_40, %c0_41] : memref<1x64xf32, #tpu.memory_space<vmem>>, vector<1x64xf32>
    %84 = vector.broadcast %83 : vector<1x64xf32> to vector<8x64xf32>
    %85 = arith.addf %82, %84 : vector<8x64xf32>
    %cst_42 = arith.constant 0.000000e+00 : f32
    %86 = vector.broadcast %cst_42 : f32 to vector<8x64xf32>
    %87 = arith.maximumf %85, %86 : vector<8x64xf32>
    %c0_43 = arith.constant 0 : index
    %c0_44 = arith.constant 0 : index
    %88 = vector.load %arg13[%c0_43, %c0_44] : memref<64x32xf32, #tpu.memory_space<vmem>>, vector<64x32xf32>
    %cst_45 = arith.constant dense<0.000000e+00> : vector<8x32xf32>
    %89 = tpu.matmul %87, %88, %cst_45 {dimension_numbers = #tpu.dot_dimension_numbers<[1], [0], [0], [1], [0, 0, 1, 1], [], []>} : vector<8x64xf32>, vector<64x32xf32>, vector<8x32xf32> -> vector<8x32xf32>
    %c0_46 = arith.constant 0 : index
    %c0_47 = arith.constant 0 : index
    %90 = vector.load %arg14[%c0_46, %c0_47] : memref<1x32xf32, #tpu.memory_space<vmem>>, vector<1x32xf32>
    %91 = vector.broadcast %90 : vector<1x32xf32> to vector<8x32xf32>
    %92 = arith.addf %89, %91 : vector<8x32xf32>
    %93 = arith.addf %80, %92 : vector<8x32xf32>
    %cst_48 = arith.constant dense<0.000000e+00> : vector<8xf32>
    %94 = vector.multi_reduction <add>, %93, %cst_48 [1] : vector<8x32xf32> to vector<8xf32>
    %95 = vector.shape_cast %94 : vector<8xf32> to vector<8x1xf32>
    %cst_49 = arith.constant 3.200000e+01 : f32
    %96 = vector.broadcast %cst_49 : f32 to vector<8x1xf32>
    %97 = arith.divf %95, %96 : vector<8x1xf32>
    %98 = vector.broadcast %97 : vector<8x1xf32> to vector<8x32xf32>
    %99 = arith.subf %93, %98 : vector<8x32xf32>
    %100 = arith.mulf %99, %99 : vector<8x32xf32>
    %cst_50 = arith.constant dense<0.000000e+00> : vector<8xf32>
    %101 = vector.multi_reduction <add>, %100, %cst_50 [1] : vector<8x32xf32> to vector<8xf32>
    %102 = vector.shape_cast %101 : vector<8xf32> to vector<8x1xf32>
    %cst_51 = arith.constant 3.200000e+01 : f32
    %103 = vector.broadcast %cst_51 : f32 to vector<8x1xf32>
    %104 = arith.divf %102, %103 : vector<8x1xf32>
    %105 = vector.broadcast %97 : vector<8x1xf32> to vector<8x32xf32>
    %106 = arith.subf %93, %105 : vector<8x32xf32>
    %cst_52 = arith.constant 9.99999974E-6 : f32
    %107 = vector.broadcast %cst_52 : f32 to vector<8x1xf32>
    %108 = arith.addf %104, %107 : vector<8x1xf32>
    %109 = math.rsqrt %108 : vector<8x1xf32>
    %110 = vector.broadcast %109 : vector<8x1xf32> to vector<8x32xf32>
    %111 = arith.mulf %106, %110 : vector<8x32xf32>
    %c0_53 = arith.constant 0 : index
    %c0_54 = arith.constant 0 : index
    %112 = vector.load %arg15[%c0_53, %c0_54] : memref<1x32xf32, #tpu.memory_space<vmem>>, vector<1x32xf32>
    %113 = vector.broadcast %112 : vector<1x32xf32> to vector<8x32xf32>
    %114 = arith.mulf %111, %113 : vector<8x32xf32>
    %c0_55 = arith.constant 0 : index
    %c0_56 = arith.constant 0 : index
    %115 = vector.load %arg16[%c0_55, %c0_56] : memref<1x32xf32, #tpu.memory_space<vmem>>, vector<1x32xf32>
    %116 = vector.broadcast %115 : vector<1x32xf32> to vector<8x32xf32>
    %117 = arith.addf %114, %116 : vector<8x32xf32>
    %c0_57 = arith.constant 0 : index
    %c0_58 = arith.constant 0 : index
    %c0_59 = arith.constant 0 : index
    %118 = vector.load %arg17[%c0_57, %c0_58, %c0_59] : memref<1x8x32xf32, #tpu.memory_space<vmem>>, vector<1x8x32xf32>
    %119 = vector.shape_cast %118 : vector<1x8x32xf32> to vector<8x32xf32>
    %120 = vector.shape_cast %117 : vector<8x32xf32> to vector<1x8x32xf32>
    tpu.vector_store %arg17[%c0_57, %c0_58, %c0_59], %120 {strides = array<i32>} : memref<1x8x32xf32, #tpu.memory_space<vmem>>, vector<1x8x32xf32>,
    return
  }
  func.func @transform_0(%arg0: i32, %arg1: i32) -> (i32, i32, i32) {
    %c0_i32 = arith.constant 0 : i32
    %c0_i32_0 = arith.constant 0 : i32
    return %arg0, %arg1, %c0_i32 : i32, i32, i32
  }
  func.func @transform_1(%arg0: i32, %arg1: i32) -> (i32, i32, i32) {
    %c0_i32 = arith.constant 0 : i32
    %c0_i32_0 = arith.constant 0 : i32
    %c0_i32_1 = arith.constant 0 : i32
    return %arg0, %c0_i32, %c0_i32_0 : i32, i32, i32
  }
  func.func @transform_2(%arg0: i32, %arg1: i32) -> (i32, i32, i32) {
    %c0_i32 = arith.constant 0 : i32
    %c0_i32_0 = arith.constant 0 : i32
    %c0_i32_1 = arith.constant 0 : i32
    return %arg0, %c0_i32, %c0_i32_0 : i32, i32, i32
  }
  func.func @transform_3(%arg0: i32, %arg1: i32) -> (i32, i32) {
    %c0_i32 = arith.constant 0 : i32
    %c0_i32_0 = arith.constant 0 : i32
    %c0_i32_1 = arith.constant 0 : i32
    return %c0_i32, %c0_i32_0 : i32, i32
  }
  func.func @transform_4(%arg0: i32, %arg1: i32) -> (i32, i32) {
    %c0_i32 = arith.constant 0 : i32
    %c0_i32_0 = arith.constant 0 : i32
    %c0_i32_1 = arith.constant 0 : i32
    return %c0_i32, %c0_i32_0 : i32, i32
  }
  func.func @transform_5(%arg0: i32, %arg1: i32) -> (i32, i32) {
    %c0_i32 = arith.constant 0 : i32
    %c0_i32_0 = arith.constant 0 : i32
    %c0_i32_1 = arith.constant 0 : i32
    return %c0_i32, %c0_i32_0 : i32, i32
  }
  func.func @transform_6(%arg0: i32, %arg1: i32) -> (i32, i32) {
    %c0_i32 = arith.constant 0 : i32
    %c0_i32_0 = arith.constant 0 : i32
    %c0_i32_1 = arith.constant 0 : i32
    return %c0_i32, %c0_i32_0 : i32, i32
  }
  func.func @transform_7(%arg0: i32, %arg1: i32) -> (i32, i32) {
    %c0_i32 = arith.constant 0 : i32
    %c0_i32_0 = arith.constant 0 : i32
    %c0_i32_1 = arith.constant 0 : i32
    return %c0_i32, %c0_i32_0 : i32, i32
  }
  func.func @transform_8(%arg0: i32, %arg1: i32) -> (i32, i32) {
    %c0_i32 = arith.constant 0 : i32
    %c0_i32_0 = arith.constant 0 : i32
    %c0_i32_1 = arith.constant 0 : i32
    return %c0_i32, %c0_i32_0 : i32, i32
  }
  func.func @transform_9(%arg0: i32, %arg1: i32) -> (i32, i32) {
    %c0_i32 = arith.constant 0 : i32
    %c0_i32_0 = arith.constant 0 : i32
    %c0_i32_1 = arith.constant 0 : i32
    return %c0_i32, %c0_i32_0 : i32, i32
  }
  func.func @transform_10(%arg0: i32, %arg1: i32) -> (i32, i32) {
    %c0_i32 = arith.constant 0 : i32
    %c0_i32_0 = arith.constant 0 : i32
    %c0_i32_1 = arith.constant 0 : i32
    return %c0_i32, %c0_i32_0 : i32, i32
  }
  func.func @transform_11(%arg0: i32, %arg1: i32) -> (i32, i32) {
    %c0_i32 = arith.constant 0 : i32
    %c0_i32_0 = arith.constant 0 : i32
    %c0_i32_1 = arith.constant 0 : i32
    return %c0_i32, %c0_i32_0 : i32, i32
  }
  func.func @transform_12(%arg0: i32, %arg1: i32) -> (i32, i32) {
    %c0_i32 = arith.constant 0 : i32
    %c0_i32_0 = arith.constant 0 : i32
    %c0_i32_1 = arith.constant 0 : i32
    return %c0_i32, %c0_i32_0 : i32, i32
  }
  func.func @transform_13(%arg0: i32, %arg1: i32) -> (i32, i32) {
    %c0_i32 = arith.constant 0 : i32
    %c0_i32_0 = arith.constant 0 : i32
    %c0_i32_1 = arith.constant 0 : i32
    return %c0_i32, %c0_i32_0 : i32, i32
  }
  func.func @transform_14(%arg0: i32, %arg1: i32) -> (i32, i32) {
    %c0_i32 = arith.constant 0 : i32
    %c0_i32_0 = arith.constant 0 : i32
    %c0_i32_1 = arith.constant 0 : i32
    return %c0_i32, %c0_i32_0 : i32, i32
  }
  func.func @transform_15(%arg0: i32, %arg1: i32) -> (i32, i32, i32) {
    %c0_i32 = arith.constant 0 : i32
    %c0_i32_0 = arith.constant 0 : i32
    return %arg0, %arg1, %c0_i32 : i32, i32, i32
  }
}

</mosaic_0001>

<bundles_post_ra>
// kernel: tpu_custom_call.1
= control target key start
LH: loop header
LB: loop body
LE: loop exit
PB: predicated region body
PF: predicated region fallthrough
CT: control target
= control target key end

     0   :  { %s2936_s0 = inlined_call_operand.hbm [shape: f32[2,8,32], index: 0, kind: input, shape index: {}]   ;;  %s2937_s1 = inlined_call_operand.hbm [shape: f32[2,8,32], index: 1, kind: input, shape index: {}]   ;;  %s2938_s2 = inlined_call_operand.vmem [shape: f32[2,1,8], index: 2, kind: input, shape index: {}]   ;;  %s2939_s3 = inlined_call_operand.vmem [shape: f32[32,96], index: 3, kind: input, shape index: {}]   ;;  %s2940_s4 = inlined_call_operand.vmem [shape: f32[1,96], index: 4, kind: input, shape index: {}]   ;;  %s2941_s5 = inlined_call_operand.vmem [shape: f32[32,32], index: 5, kind: input, shape index: {}]   ;;  %s2942_s6 = inlined_call_operand.vmem [shape: f32[1,32], index: 6, kind: input, shape index: {}]   ;;  %s2943_s7 = inlined_call_operand.vmem [shape: f32[1,32], index: 7, kind: input, shape index: {}]   ;;  %s2944_s8 = inlined_call_operand.vmem [shape: f32[1,32], index: 8, kind: input, shape index: {}]   ;;  %s2945_s9 = inlined_call_operand.vmem [shape: f32[32,64], index: 9, kind: input, shape index: {}]   ;;  %s2946_s10 = inlined_call_operand.vmem [shape: f32[1,64], index: 10, kind: input, shape index: {}]   ;;  %s2947_s11 = inlined_call_operand.vmem [shape: f32[64,32], index: 11, kind: input, shape index: {}]   ;;  %s2948_s12 = inlined_call_operand.vmem [shape: f32[1,32], index: 12, kind: input, shape index: {}]   ;;  %s2949_s13 = inlined_call_operand.vmem [shape: f32[1,32], index: 13, kind: input, shape index: {}]   ;;  %s2950_s14 = inlined_call_operand.vmem [shape: f32[1,32], index: 14, kind: input, shape index: {}]   ;;  %s2951_s15 = inlined_call_operand.hbm [shape: f32[2,8,32], index: 15, kind: output, shape index: {}]  }
   0x1   :  { %2962 = sst [smem:[#allocation19_spill]] %s2936_s0 }
   0x2   :  { %2963 = sst [smem:[#allocation20_spill]] %s2949_s13 }
   0x3   :  { %2964 = sst [smem:[#allocation21_spill]] %s2950_s14 }
   0x4   :  { %2965 = sst [smem:[#allocation22_spill]] %s2951_s15 }
   0x5   :  { %20 = vsyncpa [#allocation5], 0 }
   0x6   :  { %22 = vsyncpa [#allocation5 + $0x1], 0 }
   0x7   :  { %23 = vsyncpa [#allocation8], 0 }
   0x8   :  { %25 = vsyncpa [#allocation8 + $0x1], 0 }
   0x9   :  { %26 = vsyncpa [#allocation6], 0 }
   0xa   :  { %28 = vsyncpa [#allocation6 + $0x1], 0  ;;  %s2516_s18 = smov 0   ;;  %s2518_s19 = smov 0  }
   0xb   :  { %s2520_s20 = smov 0   ;;  %s2522_s21 = smov 0  }
   0xc   :  { %s2524_s22 = smov 0   ;;  %s2526_s23 = smov 0  }
   0xd LB: > { %2966 = sst [smem:[#allocation13_spill]] %s2398_s18  ;;  %s1935_s24 = sadd.s32 4294967295, %s2418_s23   ;;  %s2418_s23 = sphi %s2526_s23, %s34_s23   ;;  %s2414_s22 = sphi %s2524_s22, %s2996_s22   ;;  %s2410_s21 = sphi %s2522_s21, %s2995_s21   ;;  %s2406_s20 = sphi %s2520_s20, %s2994_s20   ;;  %s2402_s19 = sphi %s2518_s19, %s2998_s19   ;;  %s2398_s18 = sphi %s2516_s18, %s2997_s18  }
   0xe   : > { %2967 = sst [smem:[#allocation14_spill]] %s2406_s20  ;;  %s1936_s25 = sadd.s32 4294967294, %s2418_s23  }
   0xf   : > { %2968 = sst [smem:[#allocation15_spill]] %s2414_s22  ;;  %s46_s26 = sadd.s32 1, %s2414_s22 }
  0x10   : > { %s55_s27 = sadd.s32 1, %s2406_s20  ;;  %p48_p0 = scmp.ge.s32.totalorder %s46_s26, 2 }
  0x11   : > { %p62_p1 = scmp.ne.s32.totalorder %s2406_s20, %s2402_s19  ;;  %p63_p2 = scmp.eq.s32.totalorder %s2418_s23, 0 }
  0x12   : > { %p68_p3 = scmp.ne.s32.totalorder %s2402_s19, %s2398_s18  ;;  %s3000_s26 = smov (%p48_p0, %s46_s26), 0 }
  0x13   : > { %2969 = sst [smem:[#allocation16_spill]] %s3000_s26  ;;  %p2557_p4 = por %p63_p2, %p62_p1 }
  0x14   : > { %p69_p5 = scmp.eq.s32.totalorder %s1935_s24, 0  ;;  %s50_s29 = ssub.s32 %s2414_s22, %s3000_s26 }
  0x15   : > { %p398_p6 = scmp.eq.s32.totalorder %s1935_s24, 1  ;;  %p53_p7 = scmp.eq.s32.totalorder %s50_s29, 0 }
  0x16   : > { %p2563_p8 = por %p69_p5, %p68_p3  ;;  %p404_p10 = scmp.eq.s32.totalorder %s1936_s25, 1 }
  0x17   : > { %p2567_p9 = por %p398_p6, %p62_p1  ;;  %p2179_p13 = scmp.lt.s32.totalorder %s2418_s23, 2 }
  0x18   : > { %s2971_s30 = scalar_select %p2563_p8, 1, 0 }
  0x19   : > { %s2972_s16 = scalar_select %p2567_p9, 1, 0 }
  0x1a   : > { %s2572_s17 = scalar_select %p53_p7, %s2406_s20, %s55_s27  }
  0x1b   : > { %p2574_p11 = por %p404_p10, %p68_p3  ;;  %s2581_s24 = sand.u32 1, %s2406_s20  }
  0x1c   : > { %2973 = sst [smem:[#allocation17_spill]] %s2572_s17  ;;  %s2956_s29 = sshll.u32 %s2581_s24, 3 }
  0x1d   : > { %s2974_s18 = scalar_select %p2574_p11, 1, 0 }
  0x1e   : > { %s2957_s26 = sshll.u32 %s2414_s22, 7  ;;  %s2976_s0 = sld [smem:[#allocation19_spill]] }
  0x1f   : > { %2975 = sst [smem:[#allocation18_spill]] %s2974_s18  ;;  %s464_s27 = scalar_lea.vmem [#allocation4], %s2956_s29 }
  0x20   : > { %s472_s17 = sshll.u32 %s464_s27, 4  ;;  %p2598_p0 = pnand %p2179_p13, %p2557_p4  ;;  %s2594_s17 = int_to_ptr.vmem [resolvable:$true] %s472_s17 }
  0x21   : > { %s461_s14 = scalar_lea.sflag [#allocation5], %s2581_s24 }
  0x22   : > { %p2274_p5 = pneg %p2598_p0 }
  0x24   : > { %s2590_s25 = scalar_lea.hbm %s2976_s0, %s2957_s26  ;;  %s2277_s28 = scalar_lea.hbm %s2976_s0, 256 }
  0x25   : > { %s2272_s15 = scalar_lea.hbm %s2590_s25, 128  ;;  %p2278_p4 = scmp.lt.u32.totalorder %s2590_s25, %s2976_s0 }
  0x26   : > { %p2273_p3 = scmp.ne.s32.totalorder %s2590_s25, %s2272_s15  ;;  %p2279_p10 = scmp.lt.u32.totalorder %s2277_s28, %s2272_s15 }
  0x27   : > { %p2281_p12 = scmp.lt.u32.totalorder %s2272_s15, %s2590_s25 }
  0x28   : > { %p2275_p6 = pnand %p2274_p5, %p2273_p3  ;;  %p2280_p13 = por %p2279_p10, %p2278_p4 }
  0x2a   : > { %p2276_p7 = pneg %p2275_p6  ;;  %p2282_p1 = por %p2281_p12, %p2280_p13 }
  0x2c   : > { %p2283_p2 = pnand %p2282_p1, %p2276_p7 }
  0x2e   : > { %2286 = shalt.err (!%p2283_p2)
}
  0x2f   : > { %s2287_s13 = scalar_lea.vmem %s2594_s17, 128  ;;  %s2420_s29 = smov [#allocation4]  }
  0x30   : > { %p2288_p3 = scmp.ne.s32.totalorder %s2594_s17, %s2287_s13  ;;  %s2292_s27 = sshll.u32 %s2420_s29, 4  ;;  %s2293_s27 = int_to_ptr.vmem [resolvable:$false] %s2292_s27 }
  0x31   : > { %s2294_s18 = scalar_lea.vmem %s2293_s27, 256  ;;  %p2295_p9 = scmp.lt.s32.totalorder %s2594_s17, %s2293_s27 }
  0x32   : > { %p2290_p6 = pnand %p2288_p3, %p2274_p5  ;;  %p2296_p4 = scmp.lt.s32.totalorder %s2294_s18, %s2287_s13 }
  0x34   : > { %p2291_p11 = pneg %p2290_p6  ;;  %p2297_p10 = por %p2296_p4, %p2295_p9 }
  0x36   : > { %p2298_p12 = pnand %p2297_p10, %p2291_p11 }
  0x38   : > { %2301 = shalt.err (!%p2298_p12)
}
  0x39   : > { %2171 = dma.hbm_to_vmem [thread:$0]  (!%p2598_p0), %s2590_s25, 128, %s2594_s17, %s461_s14  }
  0x3a   : > { %p2978_p1 = scmp.lt.s32.totalorder %s2418_s23, 3  ;;  %p2979_p2 = scmp.ge.s32.totalorder %s2418_s23, 1 }
  0x3b   : > { %s2981_s13 = sshll.u32 %s2414_s22, 7  ;;  %s2982_s27 = sshll.u32 %s2581_s24, 3 }
  0x3c   : > { %p2634_p7 = pnand %p2979_p2, %p2978_p1  ;;  %s2643_s29 = scalar_lea.hbm %s2937_s1, %s2981_s13 }
  0x3d   : > { %s483_s18 = scalar_lea.vmem [#allocation7], %s2982_s27  ;;  %s480_s17 = scalar_lea.sflag [#allocation8], %s2581_s24 }
  0x3e   : > { %s2980_s26 = scalar_select %p2634_p7, 1, 0 }
  0x3f   : > { %s490_s0 = sshll.u32 %s483_s18, 4  ;;  %s2302_s25 = scalar_lea.hbm %s2643_s29, 128  ;;  %s491_s0 = int_to_ptr.vmem [resolvable:$true] %s490_s0 }
  0x40   : > { %p2303_p9 = scmp.ne.s32.totalorder %s2643_s29, %s2302_s25  ;;  %s2307_s13 = scalar_lea.hbm %s2937_s1, 256 }
  0x41   : > { %p2308_p3 = scmp.lt.u32.totalorder %s2643_s29, %s2937_s1  ;;  %p2309_p6 = scmp.lt.u32.totalorder %s2307_s13, %s2302_s25 }
  0x42   : > { %p2305_p11 = pnand %p2303_p9, %p2274_p5  ;;  %p2311_p10 = scmp.lt.u32.totalorder %s2302_s25, %s2643_s29 }
  0x43   : > { %p2310_p4 = por %p2309_p6, %p2308_p3 }
  0x44   : > { %p2306_p13 = pneg %p2305_p11 }
  0x45   : > { %p2312_p12 = por %p2311_p10, %p2310_p4 }
  0x47   : > { %p2313_p1 = pnand %p2312_p12, %p2306_p13 }
  0x49   : > { %2316 = shalt.err (!%p2313_p1)
}
  0x4a   : > { %s2317_s24 = scalar_lea.vmem %s491_s0, 128  ;;  %s2421_s27 = smov [#allocation7]  }
  0x4b   : > { %p2318_p2 = scmp.ne.s32.totalorder %s491_s0, %s2317_s24  ;;  %s2322_s22 = sshll.u32 %s2421_s27, 4  ;;  %s2323_s22 = int_to_ptr.vmem [resolvable:$false] %s2322_s22 }
  0x4c   : > { %s2324_s18 = scalar_lea.vmem %s2323_s22, 256  ;;  %p2325_p8 = scmp.lt.s32.totalorder %s491_s0, %s2323_s22 }
  0x4d   : > { %p2320_p9 = pnand %p2318_p2, %p2274_p5  ;;  %p2326_p7 = scmp.lt.s32.totalorder %s2324_s18, %s2317_s24 }
  0x4f   : > { %p2321_p11 = pneg %p2320_p9  ;;  %p2327_p3 = por %p2326_p7, %p2325_p8 }
  0x51   : > { %p2328_p6 = pnand %p2327_p3, %p2321_p11 }
  0x53   : > { %2331 = shalt.err (!%p2328_p6)
}
  0x54   : > { %2174 = dma.hbm_to_vmem [thread:$0]  (!%p2598_p0), %s2643_s29, 128, %s491_s0, %s480_s17  }
  0x55   : > { %p2983_p13 = scmp.ne.s32.totalorder %s2980_s26, 0 }
  0x56   : > { %s2670_s25 = sand.u32 (!%p2983_p13), 1, %s2402_s19   ;;  %p2984_p8 = scmp.ne.s32.totalorder (!%p2983_p13), %s2971_s30, 0 }
  0x57   : > { %505 = sbr.rel (%p2983_p13) target bundleno = 2716 (0xa9c), region = 80  ;;  %s2673_s14 = sshll.u32 (!%p2983_p13), %s2670_s25, 3 }
  0x58   : > { %s508_s13 = scalar_lea.sflag (!%p2983_p13), [#allocation5], %s2670_s25  ;;  %s511_s15 = scalar_lea.vmem (!%p2983_p13), [#allocation4], %s2673_s14 }
  0x5e   : > { %2385 = dma.done.wait (%p2984_p8), %s508_s13, 128  }
  0x5f   : > { %2387 = vsyncadd (%p2984_p8), %s508_s13, 4294967168  ;;  %s517_s0 = scalar_lea.sflag [#allocation8], %s2670_s25  ;;  %s520_s20 = scalar_lea.vmem [#allocation7], %s2673_s14 }
  0x60   : > { %2389 = dma.done.wait (%p2984_p8), %s517_s0, 128  }
  0x61   : > { %2391 = vsyncadd (%p2984_p8), %s517_s0, 4294967168  ;;  %v2422_v0 = vmov 0.0|0.0   ;;  %vm2423_vm0 = vmmov 0   ;;  %v2424_v1 = vmov 0.0   ;;  %v584_v2 = vld [vmem:[%s2939_s3] sm:$0xff]  ;;  %v585_v3 = vld [vmem:[%s2939_s3 + $0x8] sm:$0xff]  ;;  %v829_v39 = vlaneseq }
  0x62   : > { %2126 = vmatprep.subr.bf16.mxu1 %v2422_v0  ;;  %2031 = vmatprep.mubr.msk.f32.mxu1 %vm2423_vm0, %v2424_v1  ;;  %v586_v4 = vld [vmem:[%s2939_s3 + $0x10] sm:$0xff]  ;;  %v2242_v5 = vpack.i.bf16 %v585_v3, %v584_v2  ;;  %v587_v6 = vld [vmem:[%s2939_s3 + $0x18] sm:$0xff]  ;;  %v2133_v7 = vpack.c.bf16 %v585_v3, %v584_v2  ;;  %s2425_s18 = smov 96   ;;  %v1947_v10 = vld [vmem:[%s2940_s4] ss:$0 sm:$0xff]  ;;  %vm613_vm1 = vcmask 261120  }
  0x63   : > { %2045 = vmatprep.subr.mxu0 %v2424_v1  ;;  %2047 = vmatprep.mubr.msk.f32.mxu0 %vm2423_vm0, %v2424_v1  ;;  %v2247_v8 = vpack.i.bf16 %v587_v6, %v586_v4  ;;  %v2136_v9 = vpack.c.bf16 %v587_v6, %v586_v4  ;;  %v583_v19 = vld [vmem:[%s520_s20] sm:$0xff]  ;;  %v2721_v20 = vld [vmem:[%s511_s15] sm:$0xff]  ;;  %vm687_vm2 = vcmask 64512   ;;  %s2426_s20 = smov 112   ;;  %s2427_s15 = smov 120   ;;  %v830_v42 = vshrl.u32 %v829_v39, 7 }
  0x64   : > { %2243 = vrot.lane.b32.xlu0 %v2242_v5, %s2425_s18  ;;  %610 = vrot.lane.b32.xlu1 %v1947_v10, %s2425_s18  ;;  %s2428_s26 = smov 104   ;;  %p575_p0 = scmp.lt.s32.totalorder %s2410_s21, 1  ;;  %vm1484_vm3 = vcmask 130048   ;;  %vm1486_vm4 = vcmask 195584   ;;  %vm1703_vm5 = vcmask 523264  }
  0x65   : > { %v831_v44 = vsub.s32 0, %v830_v42  ;;  %s2429_s24 = smov 88   ;;  %s2430_s27 = smov 80   ;;  %v1489_v42 = vld [vmem:[%s2941_s5 + $0x8] sm:$0xff] }
  0x66   : > { %s576_s29 = scalar_select %p575_p0, %s2410_s21, 1 }
  0x67   : > { %s2431_s22 = smov 72   ;;  %s2432_s28 = smov 8  }
  0x68   : > { %2248 = vrot.lane.b32.xlu0 %v2247_v8, %s2425_s18  ;;  %s577_s30 = scalar_lea.vmem %s2938_s2, %s576_s29  ;;  %s1809_s29 = scalar_lea.sflag [#allocation6], %s2670_s25 }
  0x69   : > { %v724_v40 = vld [vmem:[%s577_s30] sm:$0x1]  ;;  %s2433_s30 = smov 16   ;;  %p2988_p7 = scmp.ne.s32.totalorder %s2972_s16, 0 }
  0x6a   : > { %v1949_v41 = vadd.f32 -1.0, %v724_v40 }
  0x6c   : > { %v726_v43 = vmul.f32 1e+09, %v1949_v41  ;;  %v1488_v41 = vld [vmem:[%s2941_s5] sm:$0xff] }
  0x6e   : > { %v832_v45 = vrot.slane %v726_v43, %v831_v44  ;;  %v2139_v43 = vpack.c.bf16 %v1489_v42, %v1488_v41 }
  0xd6   : > { %v2244_v11 = vpop.permute.xlu0 %2243  ;;  %v611_v21 = vpop.permute.xlu1 %610 }
  0xd7   : > { %v2246_v12 = vunpack.i.h.bf16 %v2244_v11  ;;  %v2245_v13 = vunpack.i.l.bf16 %v2244_v11 }
  0xd9   : > { %v2127_v14 = vpack.c.bf16 %v2246_v12, %v2245_v13 }
  0xda   : > { %v2249_v15 = vpop.permute.xlu0 %2248 }
  0xdb   : > { %v2251_v16 = vunpack.i.h.bf16 %v2249_v15  ;;  %v2250_v17 = vunpack.i.l.bf16 %v2249_v15  ;;  %2128 = vmatpush3.bf16.msra.mxu1 %v2127_v14 }
  0xdc   : > { %2129 = vmatprep.subr.bf16.mxu1 %v2422_v0 }
  0xdd   : > { %v2130_v18 = vpack.c.bf16 %v2251_v16, %v2250_v17 }
  0xdf   : > { %2131 = vmatpush3.bf16.msra.mxu1 %v2130_v18 }
  0xe0   : > { %2132 = vmatprep.subr.bf16.mxu1 %v2422_v0 }
  0xe2   : > { %2032 = vmatmul.mubr.msk.f32.vlgmr.msra.gmra.mrb[0].mxu1 %vm613_vm1, %v583_v19 }
  0xe3   : > { %2134 = vmatpush3.bf16.msra.mxu1 %v2133_v7  ;;  %2042 = vmatprep.mubr.msk.f32.mxu1 %vm2423_vm0, %v2424_v1 }
  0xe4   : > { %2135 = vmatprep.subr.bf16.mxu1 %v2422_v0 }
  0xe7   : > { %2137 = vmatpush3.bf16.msra.mxu1 %v2136_v9 }
  0xe8   : > { %2050 = vmatprep.subr.mxu1 %v2424_v1 }
  0xea   : > { %2043 = vmatmul.mubr.msk.f32.vlgmr.msra.gmra.mrb[2].mxu1 %vm613_vm1, %v2721_v20 }
  0xeb   : > { %2052 = vmatprep.mubr.msk.f32.mxu1 %vm2423_vm0, %v2424_v1 }
 0x1b5   : > { %v683_v22 = vpop.f32.mrb[0].mxu1 }
 0x1b6   : > { %v2728_v23 = vadd.f32 %v683_v22, %v611_v21  ;;  %v2033_v24 = vpop.f32.mrb[1].mxu1 }
 0x1b8   : > { %688 = vst.msk [vmem:[#allocation2] sm:$0xff] %vm687_vm2, %v2728_v23  ;;  %704 = vrot.lane.b32.xlu0 %v2728_v23, %s2426_s20  ;;  %694 = vrot.lane.b32.xlu1 %v2728_v23, %s2427_s15 }
 0x1bc   : > { %714 = vrot.lane.b32.xlu1 %v2728_v23, %s2428_s26 }
 0x1bd   : > { %v808_v25 = vpop.f32.mrb[2].mxu1 }
 0x1be   : > { %v809_v26 = vadd.f32 %v1947_v10, %v808_v25  ;;  %v2044_v27 = vpop.f32.mrb[3].mxu1 }
 0x1bf   : > { %v820_v28 = vld [vmem:[#allocation2] sm:$0xff] }
 0x1c0   : > { %v812_v29 = vmul.f32 0.35355338, %v809_v26  ;;  %2046 = vmatpush3.xpose.msk.msra.mxu0 %vm687_vm2, %v820_v28 }
 0x1c1   : > { %2055 = vmatprep.subr.mxu0 %v2424_v1 }
 0x1c2   : > { %814 = vrot.lane.b32.xlu0 %v812_v29, %s2427_s15  ;;  %816 = vrot.lane.b32.xlu1 %v812_v29, %s2426_s20  ;;  %s2987_s15 = sld [smem:[#allocation22_spill]] }
 0x1c3   : > { %2048 = vmatmul.mubr.msk.f32.vlgmr.msra.gmra.mrb[0].mxu0 %vm687_vm2, %v812_v29 }
 0x1c4   : > { %2057 = vmatprep.mubr.msk.f32.mxu0 %vm2423_vm0, %v2424_v1 }
 0x1c6   : > { %818 = vrot.lane.b32.xlu0 %v812_v29, %s2428_s26 }
 0x22a   : > { %v705_v30 = vpop.permute.xlu0 %704  ;;  %v695_v31 = vpop.permute.xlu1 %694 }
 0x22b   : > { %708 = vst.msk [vmem:[#allocation2 + $0x10] sm:$0xff] %vm687_vm2, %v705_v30  ;;  %698 = vst.msk [vmem:[#allocation2 + $0x8] sm:$0xff] %vm687_vm2, %v695_v31 }
 0x22e   : > { %v715_v32 = vpop.permute.xlu1 %714 }
 0x22f   : > { %718 = vst.msk [vmem:[#allocation2 + $0x18] sm:$0xff] %vm687_vm2, %v715_v32 }
 0x232   : > { %v821_v33 = vld [vmem:[#allocation2 + $0x8] sm:$0xff]  ;;  %v822_v34 = vld [vmem:[#allocation2 + $0x10] sm:$0xff] }
 0x233   : > { %2051 = vmatpush3.xpose.msk.msra.mxu1 %vm687_vm2, %v821_v33  ;;  %2056 = vmatpush3.xpose.msk.msra.mxu0 %vm687_vm2, %v822_v34 }
 0x234   : > { %v815_v35 = vpop.permute.xlu0 %814  ;;  %v817_v36 = vpop.permute.xlu1 %816  ;;  %2060 = vmatprep.subr.mxu1 %v2424_v1  ;;  %2065 = vmatprep.subr.mxu0 %v2424_v1 }
 0x236   : > { %2053 = vmatmul.mubr.msk.f32.vlgmr.msra.gmra.mrb[4].mxu1 %vm687_vm2, %v815_v35  ;;  %2058 = vmatmul.mubr.msk.f32.vlgmr.msra.gmra.mrb[2].mxu0 %vm687_vm2, %v817_v36  ;;  %v823_v37 = vld [vmem:[#allocation2 + $0x18] sm:$0xff] }
 0x237   : > { %2061 = vmatpush3.xpose.msk.msra.mxu1 %vm687_vm2, %v823_v37  ;;  %2062 = vmatprep.mubr.msk.f32.mxu1 %vm2423_vm0, %v2424_v1 }
 0x238   : > { %v819_v38 = vpop.permute.xlu0 %818  ;;  %2070 = vmatprep.subr.mxu1 %v2424_v1  ;;  %2067 = vmatprep.mubr.msk.f32.mxu0 %vm2423_vm0, %v2424_v1 }
 0x23a   : > { %2063 = vmatmul.mubr.msk.f32.vlgmr.msra.gmra.mrb[6].mxu1 %vm687_vm2, %v819_v38 }
 0x23b   : > { %2072 = vmatprep.mubr.msk.f32.mxu1 %vm2423_vm0, %v2424_v1 }
 0x296   : > { %v906_v46 = vpop.f32.mrb[0].mxu0 }
 0x297   : > { %v907_v47 = vadd.f32 %v906_v46, %v832_v45  ;;  %v2049_v48 = vpop.f32.mrb[1].mxu0  ;;  %v1490_v46 = vld [vmem:[%s2941_s5 + $0x10] sm:$0xff] }
 0x299   : > { %v1135_v49 = vsel %vm687_vm2, %v907_v47, -inf }
 0x29a   : > { %1136 = vmax.xlane.f32.xlu1 %v1135_v49 }
 0x309   : > { %v981_v50 = vpop.f32.mrb[4].mxu1  ;;  %v1056_v51 = vpop.f32.mrb[2].mxu0 }
 0x30a   : > { %v982_v52 = vadd.f32 %v981_v50, %v832_v45  ;;  %v2054_v53 = vpop.f32.mrb[5].mxu1  ;;  %v2059_v54 = vpop.f32.mrb[3].mxu0  ;;  %v1057_v55 = vadd.f32 %v1056_v51, %v832_v45 }
 0x30c   : > { %v1138_v56 = vsel %vm687_vm2, %v982_v52, -inf  ;;  %v1141_v60 = vsel %vm687_vm2, %v1057_v55, -inf }
 0x30d   : > { %1139 = vmax.xlane.f32.xlu0 %v1138_v56  ;;  %v1131_v57 = vpop.f32.mrb[6].mxu1 }
 0x30e   : > { %v1132_v58 = vadd.f32 %v1131_v57, %v832_v45  ;;  %v2064_v59 = vpop.f32.mrb[7].mxu1 }
 0x310   : > { %v1144_v61 = vsel %vm687_vm2, %v1132_v58, -inf }
 0x311   : > { %1142 = vmax.xlane.f32.xlu0 %v1141_v60  ;;  %1145 = vmax.xlane.f32.xlu1 %v1144_v61  ;;  %v1964_v61 = vld [vmem:[%s2942_s6] ss:$0 sm:$0xff] }
 0x322   : > { %699 = vrot.lane.b32.xlu1 %v2728_v23, %s2429_s24  ;;  %s2434_s24 = smov 24  }
 0x327   : > { %690 = vrot.lane.b32.xlu0 %v2728_v23, %s2425_s18  ;;  %v1137_v62 = vpop.xlane.xlu1 %1136  ;;  %s574_s18 = scalar_lea.vmem [#allocation9], %s2673_s14 }
 0x328   : > { %v1147_v63 = vsub.f32 %v907_v47, %v1137_v62  ;;  %v1491_v47 = vld [vmem:[%s2941_s5 + $0x18] sm:$0xff]  ;;  %s1823_s13 = sshll.u32 %s574_s18, 4  ;;  %s2888_s13 = int_to_ptr.vmem [resolvable:$true] %s1823_s13 }
 0x329   : > { %v2142_v48 = vpack.c.bf16 %v1491_v47, %v1490_v46  ;;  %s2332_s17 = scalar_lea.vmem %s2888_s13, 128 }
 0x32a   : > { %v1151_v2 = vmul.f32 1.442695, %v1147_v63  ;;  %p2333_p5 = scmp.ne.s32.totalorder %s2888_s13, %s2332_s17 }
 0x32c   : > { %2252 = vpow2.f32 %v1151_v2  ;;  %p2334_p4 = pnand %p2333_p5, %p2988_p7 }
 0x32e   : > { %p2335_p10 = pneg %p2334_p4 }
 0x336   : > { %v2253_v3 = vpop.eup %2252 }
 0x337   : > { %v1159_v4 = vsel %vm687_vm2, %v2253_v3, 0.0 }
 0x346   : > { %1160 = vadd.xlane.f32.xlu0 %v1159_v4 }
 0x39a   : > { %v1140_v5 = vpop.xlane.xlu0 %1139 }
 0x39b   : > { %v1148_v6 = vsub.f32 %v982_v52, %v1140_v5 }
 0x39d   : > { %v1153_v7 = vmul.f32 1.442695, %v1148_v6 }
 0x39e   : > { %v1143_v8 = vpop.xlane.xlu0 %1142  ;;  %v1146_v9 = vpop.xlane.xlu1 %1145 }
 0x39f   : > { %2254 = vpow2.f32 %v1153_v7  ;;  %v1149_v10 = vsub.f32 %v1057_v55, %v1143_v8  ;;  %v1150_v11 = vsub.f32 %v1132_v58, %v1146_v9 }
 0x3a1   : > { %v1155_v12 = vmul.f32 1.442695, %v1149_v10  ;;  %v1157_v13 = vmul.f32 1.442695, %v1150_v11  ;;  %v1604_v10 = vld [vmem:[%s2945_s9 + $0x8] sm:$0xff] }
 0x3a2   : > { %v691_v14 = vpop.permute.xlu0 %690  ;;  %v700_v15 = vpop.permute.xlu1 %699 }
 0x3a3   : > { %2256 = vpow2.f32 %v1155_v12  ;;  %693 = vst.msk [vmem:[#allocation3] sm:$0xff] %vm687_vm2, %v691_v14  ;;  %703 = vst.msk [vmem:[#allocation3 + $0x8] sm:$0xff] %vm687_vm2, %v700_v15  ;;  %v1606_v12 = vld [vmem:[%s2945_s9 + $0x18] sm:$0xff]  ;;  %v1688_v14 = vld [vmem:[%s2947_s11] sm:$0xff] }
 0x3a4   : > { %2258 = vpow2.f32 %v1157_v13  ;;  %v1689_v15 = vld [vmem:[%s2947_s11 + $0x8] sm:$0xff] }
 0x3a9   : > { %v2255_v16 = vpop.eup %2254 }
 0x3aa   : > { %v824_v17 = vld [vmem:[#allocation3] sm:$0xff]  ;;  %v1162_v18 = vsel %vm687_vm2, %v2255_v16, 0.0  ;;  %v825_v19 = vld [vmem:[#allocation3 + $0x8] sm:$0xff] }
 0x3ab   : > { %2066 = vmatpush3.msra.mxu0 %v824_v17  ;;  %1163 = vadd.xlane.f32.xlu1 %v1162_v18  ;;  %v2151_v17 = vpack.c.bf16 %v1689_v15, %v1688_v14  ;;  %v1691_v18 = vld [vmem:[%s2947_s11 + $0x18] sm:$0xff] }
 0x3ac   : > { %2071 = vmatpush3.msra.mxu1 %v825_v19  ;;  %2075 = vmatprep.subr.mxu0 %v2424_v1 }
 0x3ad   : > { %v2257_v21 = vpop.eup %2256  ;;  %2080 = vmatprep.subr.mxu1 %v2424_v1 }
 0x3ae   : > { %v2259_v22 = vpop.eup %2258  ;;  %v1165_v24 = vsel %vm687_vm2, %v2257_v21, 0.0 }
 0x3af   : > { %1166 = vadd.xlane.f32.xlu0 %v1165_v24  ;;  %v1168_v25 = vsel %vm687_vm2, %v2259_v22, 0.0 }
 0x3b0   : > { %1169 = vadd.xlane.f32.xlu1 %v1168_v25 }
 0x3c1   : > { %709 = vrot.lane.b32.xlu1 %v2728_v23, %s2430_s27  ;;  %s2986_s27 = sld [smem:[#allocation21_spill]] }
 0x3c5   : > { %719 = vrot.lane.b32.xlu0 %v2728_v23, %s2431_s22  ;;  %s1975_s22 = sshll.u32 %s2410_s21, 7  ;;  %s2435_s21 = smov [#allocation9]  }
 0x3c6   : > { %s2886_s26 = scalar_lea.hbm %s2987_s15, %s1975_s22  ;;  %s2336_s14 = sshll.u32 %s2435_s21, 4  ;;  %s2337_s14 = int_to_ptr.vmem [resolvable:$false] %s2336_s14 }
 0x3c7   : > { %p2339_p12 = scmp.lt.s32.totalorder %s2888_s13, %s2337_s14 }
 0x3d3   : > { %v1161_v26 = vpop.xlane.xlu0 %1160 }
 0x3d4   : > { %2260 = vrcp.f32 %v1161_v26 }
 0x3de   : > { %v2261_v27 = vpop.eup %2260 }
 0x3df   : > { %v1175_v28 = vmul.f32 %v2261_v27, %v2253_v3 }
 0x3e1   : > { %2068 = vmatmul.mubr.msk.f32.vlgmr.msra.gmra.mrb[4].mxu0 %vm687_vm2, %v1175_v28 }
 0x3e2   : > { %2077 = vmatprep.mubr.msk.f32.mxu0 %vm2423_vm0, %v2424_v1 }
 0x438   : > { %v1164_v29 = vpop.xlane.xlu1 %1163 }
 0x439   : > { %2262 = vrcp.f32 %v1164_v29  ;;  %v1966_v29 = vld [vmem:[%s2943_s7] ss:$0 sm:$0xff] }
 0x43c   : > { %v1167_v30 = vpop.xlane.xlu0 %1166 }
 0x43d   : > { %2264 = vrcp.f32 %v1167_v30  ;;  %v1170_v31 = vpop.xlane.xlu1 %1169 }
 0x43e   : > { %2266 = vrcp.f32 %v1170_v31  ;;  %v1967_v31 = vld [vmem:[%s2944_s8] ss:$0 sm:$0xff] }
 0x440   : > { %v720_v32 = vpop.permute.xlu0 %719 }
 0x441   : > { %723 = vst.msk [vmem:[#allocation3 + $0x18] sm:$0xff] %vm687_vm2, %v720_v32  ;;  %v710_v33 = vpop.permute.xlu1 %709 }
 0x442   : > { %713 = vst.msk [vmem:[#allocation3 + $0x10] sm:$0xff] %vm687_vm2, %v710_v33 }
 0x443   : > { %v2263_v23 = vpop.eup %2262 }
 0x444   : > { %v1176_v34 = vmul.f32 %v2263_v23, %v2255_v16  ;;  %v1690_v16 = vld [vmem:[%s2947_s11 + $0x10] sm:$0xff]  ;;  %v1695_v23 = vld [vmem:[%s2947_s11 + $0x38] sm:$0xff] }
 0x445   : > { %v2154_v19 = vpack.c.bf16 %v1691_v18, %v1690_v16 }
 0x446   : > { %2073 = vmatmul.mubr.msk.f32.vlgmr.msra.gmra.mrb[8].mxu1 %vm687_vm2, %v1176_v34 }
 0x447   : > { %v2265_v35 = vpop.eup %2264  ;;  %2082 = vmatprep.mubr.msk.f32.mxu1 %vm2423_vm0, %v2424_v1 }
 0x448   : > { %v2267_v36 = vpop.eup %2266  ;;  %v1177_v37 = vmul.f32 %v2265_v35, %v2257_v21  ;;  %v827_v38 = vld [vmem:[#allocation3 + $0x18] sm:$0xff]  ;;  %v1692_v21 = vld [vmem:[%s2947_s11 + $0x20] sm:$0xff] }
 0x449   : > { %v1178_v39 = vmul.f32 %v2267_v36, %v2259_v22  ;;  %v826_v40 = vld [vmem:[#allocation3 + $0x10] sm:$0xff]  ;;  %2081 = vmatpush3.msra.mxu1 %v827_v38  ;;  %v1693_v22 = vld [vmem:[%s2947_s11 + $0x28] sm:$0xff]  ;;  %v1968_v35 = vld [vmem:[%s2946_s10] ss:$0 sm:$0xff] }
 0x44a   : > { %2076 = vmatpush3.msra.mxu0 %v826_v40  ;;  %2144 = vmatprep.subr.bf16.mxu1 %v2422_v0  ;;  %v2157_v24 = vpack.c.bf16 %v1693_v22, %v1692_v21  ;;  %v1970_v40 = vld [vmem:[%s2948_s12] ss:$0 sm:$0xff] }
 0x44b   : > { %2078 = vmatmul.mubr.msk.f32.vlgmr.msra.gmra.mrb[6].mxu0 %vm687_vm2, %v1177_v37  ;;  %2083 = vmatmul.mubr.msk.f32.vlgmr.msra.gmra.mrb[10].mxu1 %vm687_vm2, %v1178_v39 }
 0x44c   : > { %2138 = vmatprep.subr.bf16.mxu0 %v2422_v0  ;;  %2093 = vmatprep.mubr.msk.f32.mxu0 %vm2423_vm0, %v2424_v1 }
 0x44d   : > { %2104 = vmatprep.mubr.msk.f32.mxu1 %vm2423_vm0, %v2424_v1  ;;  %2140 = vmatpush3.bf16.msra.mxu0 %v2139_v43 }
 0x44e   : > { %2141 = vmatprep.subr.bf16.mxu0 %v2422_v0 }
 0x451   : > { %2143 = vmatpush3.bf16.msra.mxu0 %v2142_v48 }
 0x452   : > { %2150 = vmatprep.subr.bf16.mxu0 %v2422_v0 }
 0x4b4   : > { %v1248_v44 = vpop.f32.mrb[4].mxu0 }
 0x4b5   : > { %v2069_v45 = vpop.f32.mrb[5].mxu0 }
 0x519   : > { %v1321_v49 = vpop.f32.mrb[8].mxu1 }
 0x51a   : > { %1472 = vrot.lane.b32.xlu1 %v1321_v49, %s2432_s28  ;;  %v2074_v50 = vpop.f32.mrb[9].mxu1  ;;  %s2985_s28 = sld [smem:[#allocation20_spill]] }
 0x51e   : > { %v1394_v51 = vpop.f32.mrb[6].mxu0  ;;  %v1467_v52 = vpop.f32.mrb[10].mxu1 }
 0x51f   : > { %1476 = vrot.lane.b32.xlu0 %v1394_v51, %s2433_s30  ;;  %v2079_v53 = vpop.f32.mrb[7].mxu0  ;;  %1480 = vrot.lane.b32.xlu1 %v1467_v52, %s2434_s24  ;;  %v2084_v54 = vpop.f32.mrb[11].mxu1 }
 0x58c   : > { %v1473_v55 = vpop.permute.xlu1 %1472 }
 0x58d   : > { %v1483_v56 = vsel %vm687_vm2, %v1248_v44, %v1473_v55  ;;  %v1972_v55 = vld [vmem:[%s2985_s28] ss:$0 sm:$0xff]  ;;  %s2338_s28 = scalar_lea.vmem %s2337_s14, 256 }
 0x58e   : > { %p2340_p1 = scmp.lt.s32.totalorder %s2338_s28, %s2332_s17 }
 0x590   : > { %p2341_p2 = por %p2340_p1, %p2339_p12 }
 0x591   : > { %v1477_v57 = vpop.permute.xlu0 %1476  ;;  %v1481_v58 = vpop.permute.xlu1 %1480 }
 0x592   : > { %v1485_v59 = vsel %vm1484_vm3, %v1483_v56, %v1477_v57  ;;  %v1973_v57 = vld [vmem:[%s2986_s27] ss:$0 sm:$0xff]  ;;  %p2342_p9 = pnand %p2341_p2, %p2335_p10 }
 0x593   : > { %v1487_v60 = vsel %vm1486_vm4, %v1485_v59, %v1481_v58 }
 0x594   : > { %2094 = vmatmul.mubr.msk.f32.vlgmr.msra.gmra.mrb[8].mxu0 %vm613_vm1, %v1487_v60 }
 0x595   : > { %2123 = vmatprep.mubr.msk.f32.mxu0 %vm2423_vm0, %v2424_v1  ;;  %v1603_v1 = vld [vmem:[%s2945_s9] sm:$0xff]  ;;  %2152 = vmatpush3.bf16.msra.mxu0 %v2151_v17 }
 0x596   : > { %v2145_v11 = vpack.c.bf16 %v1604_v10, %v1603_v1  ;;  %2153 = vmatprep.subr.bf16.mxu0 %v2422_v0 }
 0x598   : > { %2146 = vmatpush3.bf16.msra.mxu1 %v2145_v11 }
 0x599   : > { %2147 = vmatprep.subr.bf16.mxu1 %v2422_v0  ;;  %2155 = vmatpush3.bf16.msra.mxu0 %v2154_v19 }
 0x59a   : > { %2156 = vmatprep.subr.bf16.mxu0 %v2422_v0 }
 0x59d   : > { %2158 = vmatpush3.bf16.msra.mxu0 %v2157_v24 }
 0x59e   : > { %2159 = vmatprep.subr.bf16.mxu0 %v2422_v0  ;;  %v1694_v0 = vld [vmem:[%s2947_s11 + $0x30] sm:$0xff] }
 0x59f   : > { %v2160_v34 = vpack.c.bf16 %v1695_v23, %v1694_v0 }
 0x5a1   : > { %2161 = vmatpush3.bf16.msra.mxu0 %v2160_v34 }
 0x667   : > { %v1568_v62 = vpop.f32.mrb[8].mxu0 }
 0x668   : > { %v1569_v63 = vadd.f32 %v1964_v61, %v1568_v62  ;;  %v2095_v2 = vpop.f32.mrb[9].mxu0 }
 0x66a   : > { %v1572_v3 = vadd.f32 %v1569_v63, %v2721_v20  ;;  %v1605_v20 = vld [vmem:[%s2945_s9 + $0x10] sm:$0xff] }
 0x66b   : > { %v2148_v13 = vpack.c.bf16 %v1606_v12, %v1605_v20 }
 0x66c   : > { %v1573_v4 = vsel %vm613_vm1, %v1572_v3, 0.0 }
 0x66d   : > { %1574 = vadd.xlane.f32.xlu0 %v1573_v4  ;;  %2149 = vmatpush3.bf16.msra.mxu1 %v2148_v13 }
 0x6fa   : > { %v1575_v5 = vpop.xlane.xlu0 %1574 }
 0x6fb   : > { %v1577_v6 = vmul.f32 0.03125, %v1575_v5 }
 0x6fd   : > { %v1578_v7 = vsub.f32 %v1572_v3, %v1577_v6 }
 0x6ff   : > { %v1579_v8 = vmul.f32 %v1578_v7, %v1578_v7 }
 0x701   : > { %v1580_v9 = vsel %vm613_vm1, %v1579_v8, 0.0 }
 0x702   : > { %1581 = vadd.xlane.f32.xlu1 %v1580_v9 }
 0x78f   : > { %v1582_v25 = vpop.xlane.xlu1 %1581 }
 0x790   : > { %v1583_v26 = vmul.f32 0.03125, %v1582_v25 }
 0x792   : > { %v1584_v27 = vadd.f32 1e-05, %v1583_v26 }
 0x794   : > { %2268 = vrsqrt.f32 %v1584_v27 }
 0x79e   : > { %v2269_v28 = vpop.eup %2268 }
 0x79f   : > { %v1586_v30 = vmul.f32 %v2269_v28, %v1578_v7 }
 0x7a1   : > { %v1594_v32 = vmul.f32 %v1966_v29, %v1586_v30 }
 0x7a3   : > { %v1602_v33 = vadd.f32 %v1967_v31, %v1594_v32 }
 0x7a5   : > { %2105 = vmatmul.mubr.msk.f32.vlgmr.msra.gmra.mrb[12].mxu1 %vm613_vm1, %v1602_v33 }
 0x878   : > { %v1683_v36 = vpop.f32.mrb[12].mxu1 }
 0x879   : > { %v1684_v37 = vadd.f32 %v1968_v35, %v1683_v36  ;;  %v2106_v38 = vpop.f32.mrb[13].mxu1 }
 0x87b   : > { %v1687_v39 = vmax.f32 %v1684_v37, 0.0 }
 0x87d   : > { %2124 = vmatmul.mubr.msk.f32.vlgmr.msra.gmra.mrb[10].mxu0 %vm1703_vm5, %v1687_v39 }
 0x950   : > { %v1773_v41 = vpop.f32.mrb[10].mxu0 }
 0x951   : > { %v1774_v42 = vadd.f32 %v1970_v40, %v1773_v41  ;;  %v2125_v43 = vpop.f32.mrb[11].mxu0 }
 0x953   : > { %v1777_v44 = vadd.f32 %v1774_v42, %v1602_v33 }
 0x955   : > { %v1778_v45 = vsel %vm613_vm1, %v1777_v44, 0.0 }
 0x956   : > { %1779 = vadd.xlane.f32.xlu0 %v1778_v45 }
 0x9e3   : > { %v1780_v46 = vpop.xlane.xlu0 %1779 }
 0x9e4   : > { %v1781_v47 = vmul.f32 0.03125, %v1780_v46 }
 0x9e6   : > { %v1782_v48 = vsub.f32 %v1777_v44, %v1781_v47 }
 0x9e8   : > { %v1783_v49 = vmul.f32 %v1782_v48, %v1782_v48 }
 0x9ea   : > { %v1784_v50 = vsel %vm613_vm1, %v1783_v49, 0.0 }
 0x9eb   : > { %1785 = vadd.xlane.f32.xlu0 %v1784_v50 }
 0xa78   : > { %v1786_v51 = vpop.xlane.xlu0 %1785 }
 0xa79   : > { %v1787_v52 = vmul.f32 0.03125, %v1786_v51 }
 0xa7b   : > { %v1788_v53 = vadd.f32 1e-05, %v1787_v52 }
 0xa7d   : > { %2270 = vrsqrt.f32 %v1788_v53 }
 0xa87   : > { %v2271_v54 = vpop.eup %2270 }
 0xa88   : > { %v1790_v56 = vmul.f32 %v2271_v54, %v1782_v48 }
 0xa8a   : > { %v1798_v58 = vmul.f32 %v1972_v55, %v1790_v56 }
 0xa8c   : > { %v1806_v59 = vadd.f32 %v1973_v57, %v1798_v58 }
 0xa8e   : > { %1807 = vst.msk [vmem:[%s574_s18] sm:$0xff] %vm613_vm1, %v1806_v59 }
 0xa8f   : > { %2345 = shalt.err (!%p2342_p9)
}
 0xa90   : > { %s2346_s25 = scalar_lea.hbm %s2886_s26, 128  ;;  %s2350_s27 = scalar_lea.hbm %s2987_s15, 256 }
 0xa91   : > { %p2347_p11 = scmp.ne.s32.totalorder %s2886_s26, %s2346_s25  ;;  %p2351_p13 = scmp.lt.u32.totalorder %s2886_s26, %s2987_s15 }
 0xa92   : > { %p2352_p8 = scmp.lt.u32.totalorder %s2350_s27, %s2346_s25  ;;  %p2354_p5 = scmp.lt.u32.totalorder %s2346_s25, %s2886_s26 }
 0xa93   : > { %p2348_p3 = pnand %p2347_p11, %p2988_p7 }
 0xa94   : > { %p2353_p0 = por %p2352_p8, %p2351_p13 }
 0xa95   : > { %p2349_p6 = pneg %p2348_p3 }
 0xa96   : > { %p2355_p4 = por %p2354_p5, %p2353_p0 }
 0xa98   : > { %p2356_p10 = pnand %p2355_p4, %p2349_p6 }
 0xa9a   : > { %2359 = shalt.err (!%p2356_p10)
}
 0xa9b   : > { %2166 = dma.vmem_to_hbm [thread:$0]  (%p2988_p7), %s2888_s13, 128, %s2886_s26, %s1809_s29  }
 0xa9c PF: > { %s2989_s0 = sld [smem:[#allocation13_spill]]  ;;  %s2990_s20 = sld [smem:[#allocation18_spill]] }
 0xa9d   : > { %p2992_p1 = scmp.ge.s32.totalorder %s2418_s23, 2 }
 0xaa2   : > { %s1835_s17 = sand.u32 1, %s2989_s0   ;;  %p2991_p12 = scmp.ne.s32.totalorder %s2990_s20, 0 }
 0xaa3   : > { %s1836_s21 = scalar_lea.sflag [#allocation6], %s1835_s17 }
 0xaa4   : > { %p2176_p2 = pnand %p2992_p1, %p2991_p12 }
 0xaa6   : > { %2393 = dma.done.wait (!%p2176_p2), %s1836_s21, 128  }
 0xaa7   : > { %2395 = vsyncadd (!%p2176_p2), %s1836_s21, 4294967168  ;;  %s34_s23 = sadd.s32 1, %s2418_s23   ;;  %s2993_s14 = sld [smem:[#allocation14_spill]] }
 0xaa8   : > { %p31_p9 = scmp.ge.s32.totalorder %s34_s23, 4   ;;  %s2994_s20 = sld [smem:[#allocation17_spill]] }
 0xaa9   : > { %s2995_s21 = sld [smem:[#allocation15_spill]]  ;;  %s2996_s22 = sld [smem:[#allocation16_spill]] }
 0xaaa   : > { %s2997_s18 = smov %s2402_s19  ;;  %33 = sbr.rel (!%p31_p9) target bundleno = 13 (0xd), region = 151 }
 0xaad   : > { %s2998_s19 = smov %s2993_s14 }
 0xab1   :  { %1841 = vsyncpa [#allocation5], 1 }
 0xab2   :  { %1843 = vsyncpa [#allocation5 + $0x1], 1 }
 0xab3   :  { %1844 = vsyncpa [#allocation8], 1 }
 0xab4   :  { %1846 = vsyncpa [#allocation8 + $0x1], 1 }
 0xab5   :  { %1847 = vsyncpa [#allocation6], 1 }
 0xab6   :  { %1849 = vsyncpa [#allocation6 + $0x1], 1 }

// kernel: tpu_custom_call.1
= control target key start
LH: loop header
LB: loop body
LE: loop exit
PB: predicated region body
PF: predicated region fallthrough
CT: control target
= control target key end

     0   :  { %s2936_s0 = inlined_call_operand.hbm [shape: f32[2,8,32], index: 0, kind: input, shape index: {}]   ;;  %s2937_s1 = inlined_call_operand.hbm [shape: f32[2,8,32], index: 1, kind: input, shape index: {}]   ;;  %s2938_s2 = inlined_call_operand.vmem [shape: f32[2,1,8], index: 2, kind: input, shape index: {}]   ;;  %s2939_s3 = inlined_call_operand.vmem [shape: f32[32,96], index: 3, kind: input, shape index: {}]   ;;  %s2940_s4 = inlined_call_operand.vmem [shape: f32[1,96], index: 4, kind: input, shape index: {}]   ;;  %s2941_s5 = inlined_call_operand.vmem [shape: f32[32,32], index: 5, kind: input, shape index: {}]   ;;  %s2942_s6 = inlined_call_operand.vmem [shape: f32[1,32], index: 6, kind: input, shape index: {}]   ;;  %s2943_s7 = inlined_call_operand.vmem [shape: f32[1,32], index: 7, kind: input, shape index: {}]   ;;  %s2944_s8 = inlined_call_operand.vmem [shape: f32[1,32], index: 8, kind: input, shape index: {}]   ;;  %s2945_s9 = inlined_call_operand.vmem [shape: f32[32,64], index: 9, kind: input, shape index: {}]   ;;  %s2946_s10 = inlined_call_operand.vmem [shape: f32[1,64], index: 10, kind: input, shape index: {}]   ;;  %s2947_s11 = inlined_call_operand.vmem [shape: f32[64,32], index: 11, kind: input, shape index: {}]   ;;  %s2948_s12 = inlined_call_operand.vmem [shape: f32[1,32], index: 12, kind: input, shape index: {}]   ;;  %s2949_s13 = inlined_call_operand.vmem [shape: f32[1,32], index: 13, kind: input, shape index: {}]   ;;  %s2950_s14 = inlined_call_operand.vmem [shape: f32[1,32], index: 14, kind: input, shape index: {}]   ;;  %s2951_s15 = inlined_call_operand.hbm [shape: f32[2,8,32], index: 15, kind: output, shape index: {}]  }
   0x1   :  { %2962 = sst [smem:[#allocation19_spill]] %s2936_s0 }
   0x2   :  { %2963 = sst [smem:[#allocation20_spill]] %s2949_s13 }
   0x3   :  { %2964 = sst [smem:[#allocation21_spill]] %s2950_s14 }
   0x4   :  { %2965 = sst [smem:[#allocation22_spill]] %s2951_s15 }
   0x5   :  { %20 = vsyncpa [#allocation5], 0 }
   0x6   :  { %22 = vsyncpa [#allocation5 + $0x1], 0 }
   0x7   :  { %23 = vsyncpa [#allocation8], 0 }
   0x8   :  { %25 = vsyncpa [#allocation8 + $0x1], 0 }
   0x9   :  { %26 = vsyncpa [#allocation6], 0 }
   0xa   :  { %28 = vsyncpa [#allocation6 + $0x1], 0  ;;  %s2516_s18 = smov 0   ;;  %s2518_s19 = smov 0  }
   0xb   :  { %s2520_s20 = smov 0   ;;  %s2522_s21 = smov 0  }
   0xc   :  { %s2524_s22 = smov 0   ;;  %s2526_s23 = smov 0  }
   0xd LB: > { %2966 = sst [smem:[#allocation13_spill]] %s2398_s18  ;;  %s1935_s24 = sadd.s32 4294967295, %s2418_s23   ;;  %s2418_s23 = sphi %s2526_s23, %s34_s23   ;;  %s2414_s22 = sphi %s2524_s22, %s2996_s22   ;;  %s2410_s21 = sphi %s2522_s21, %s2995_s21   ;;  %s2406_s20 = sphi %s2520_s20, %s2994_s20   ;;  %s2402_s19 = sphi %s2518_s19, %s2998_s19   ;;  %s2398_s18 = sphi %s2516_s18, %s2997_s18  }
   0xe   : > { %2967 = sst [smem:[#allocation14_spill]] %s2406_s20  ;;  %s1936_s25 = sadd.s32 4294967294, %s2418_s23  }
   0xf   : > { %2968 = sst [smem:[#allocation15_spill]] %s2414_s22  ;;  %s46_s26 = sadd.s32 1, %s2414_s22 }
  0x10   : > { %s55_s27 = sadd.s32 1, %s2406_s20  ;;  %p48_p0 = scmp.ge.s32.totalorder %s46_s26, 2 }
  0x11   : > { %p62_p1 = scmp.ne.s32.totalorder %s2406_s20, %s2402_s19  ;;  %p63_p2 = scmp.eq.s32.totalorder %s2418_s23, 0 }
  0x12   : > { %p68_p3 = scmp.ne.s32.totalorder %s2402_s19, %s2398_s18  ;;  %s3000_s26 = smov (%p48_p0, %s46_s26), 0 }
  0x13   : > { %2969 = sst [smem:[#allocation16_spill]] %s3000_s26  ;;  %p2557_p4 = por %p63_p2, %p62_p1 }
  0x14   : > { %p69_p5 = scmp.eq.s32.totalorder %s1935_s24, 0  ;;  %s50_s29 = ssub.s32 %s2414_s22, %s3000_s26 }
  0x15   : > { %p398_p6 = scmp.eq.s32.totalorder %s1935_s24, 1  ;;  %p53_p7 = scmp.eq.s32.totalorder %s50_s29, 0 }
  0x16   : > { %p2563_p8 = por %p69_p5, %p68_p3  ;;  %p404_p10 = scmp.eq.s32.totalorder %s1936_s25, 1 }
  0x17   : > { %p2567_p9 = por %p398_p6, %p62_p1  ;;  %p2179_p13 = scmp.lt.s32.totalorder %s2418_s23, 2 }
  0x18   : > { %s2971_s30 = scalar_select %p2563_p8, 1, 0 }
  0x19   : > { %s2972_s16 = scalar_select %p2567_p9, 1, 0 }
  0x1a   : > { %s2572_s17 = scalar_select %p53_p7, %s2406_s20, %s55_s27  }
  0x1b   : > { %p2574_p11 = por %p404_p10, %p68_p3  ;;  %s2581_s24 = sand.u32 1, %s2406_s20  }
  0x1c   : > { %2973 = sst [smem:[#allocation17_spill]] %s2572_s17  ;;  %s2956_s29 = sshll.u32 %s2581_s24, 3 }
  0x1d   : > { %s2974_s18 = scalar_select %p2574_p11, 1, 0 }
  0x1e   : > { %s2957_s26 = sshll.u32 %s2414_s22, 7  ;;  %s2976_s0 = sld [smem:[#allocation19_spill]] }
  0x1f   : > { %2975 = sst [smem:[#allocation18_spill]] %s2974_s18  ;;  %s464_s27 = scalar_lea.vmem [#allocation4], %s2956_s29 }
  0x20   : > { %s472_s17 = sshll.u32 %s464_s27, 4  ;;  %p2598_p0 = pnand %p2179_p13, %p2557_p4  ;;  %s2594_s17 = int_to_ptr.vmem [resolvable:$true] %s472_s17 }
  0x21   : > { %s461_s14 = scalar_lea.sflag [#allocation5], %s2581_s24 }
  0x22   : > { %p2274_p5 = pneg %p2598_p0 }
  0x24   : > { %s2590_s25 = scalar_lea.hbm %s2976_s0, %s2957_s26  ;;  %s2277_s28 = scalar_lea.hbm %s2976_s0, 256 }
  0x25   : > { %s2272_s15 = scalar_lea.hbm %s2590_s25, 128  ;;  %p2278_p4 = scmp.lt.u32.totalorder %s2590_s25, %s2976_s0 }
  0x26   : > { %p2273_p3 = scmp.ne.s32.totalorder %s2590_s25, %s2272_s15  ;;  %p2279_p10 = scmp.lt.u32.totalorder %s2277_s28, %s2272_s15 }
  0x27   : > { %p2281_p12 = scmp.lt.u32.totalorder %s2272_s15, %s2590_s25 }
  0x28   : > { %p2275_p6 = pnand %p2274_p5, %p2273_p3  ;;  %p2280_p13 = por %p2279_p10, %p2278_p4 }
  0x2a   : > { %p2276_p7 = pneg %p2275_p6  ;;  %p2282_p1 = por %p2281_p12, %p2280_p13 }
  0x2c   : > { %p2283_p2 = pnand %p2282_p1, %p2276_p7 }
  0x2e   : > { %2286 = shalt.err (!%p2283_p2)
}
  0x2f   : > { %s2287_s13 = scalar_lea.vmem %s2594_s17, 128  ;;  %s2420_s29 = smov [#allocation4]  }
  0x30   : > { %p2288_p3 = scmp.ne.s32.totalorder %s2594_s17, %s2287_s13  ;;  %s2292_s27 = sshll.u32 %s2420_s29, 4  ;;  %s2293_s27 = int_to_ptr.vmem [resolvable:$false] %s2292_s27 }
  0x31   : > { %s2294_s18 = scalar_lea.vmem %s2293_s27, 256  ;;  %p2295_p9 = scmp.lt.s32.totalorder %s2594_s17, %s2293_s27 }
  0x32   : > { %p2290_p6 = pnand %p2288_p3, %p2274_p5  ;;  %p2296_p4 = scmp.lt.s32.totalorder %s2294_s18, %s2287_s13 }
  0x34   : > { %p2291_p11 = pneg %p2290_p6  ;;  %p2297_p10 = por %p2296_p4, %p2295_p9 }
  0x36   : > { %p2298_p12 = pnand %p2297_p10, %p2291_p11 }
  0x38   : > { %2301 = shalt.err (!%p2298_p12)
}
  0x39   : > { %2171 = dma.hbm_to_vmem [thread:$0]  (!%p2598_p0), %s2590_s25, 128, %s2594_s17, %s461_s14  }
  0x3a   : > { %p2978_p1 = scmp.lt.s32.totalorder %s2418_s23, 3  ;;  %p2979_p2 = scmp.ge.s32.totalorder %s2418_s23, 1 }
  0x3b   : > { %s2981_s13 = sshll.u32 %s2414_s22, 7  ;;  %s2982_s27 = sshll.u32 %s2581_s24, 3 }
  0x3c   : > { %p2634_p7 = pnand %p2979_p2, %p2978_p1  ;;  %s2643_s29 = scalar_lea.hbm %s2937_s1, %s2981_s13 }
  0x3d   : > { %s483_s18 = scalar_lea.vmem [#allocation7], %s2982_s27  ;;  %s480_s17 = scalar_lea.sflag [#allocation8], %s2581_s24 }
  0x3e   : > { %s2980_s26 = scalar_select %p2634_p7, 1, 0 }
  0x3f   : > { %s490_s0 = sshll.u32 %s483_s18, 4  ;;  %s2302_s25 = scalar_lea.hbm %s2643_s29, 128  ;;  %s491_s0 = int_to_ptr.vmem [resolvable:$true] %s490_s0 }
  0x40   : > { %p2303_p9 = scmp.ne.s32.totalorder %s2643_s29, %s2302_s25  ;;  %s2307_s13 = scalar_lea.hbm %s2937_s1, 256 }
  0x41   : > { %p2308_p3 = scmp.lt.u32.totalorder %s2643_s29, %s2937_s1  ;;  %p2309_p6 = scmp.lt.u32.totalorder %s2307_s13, %s2302_s25 }
  0x42   : > { %p2305_p11 = pnand %p2303_p9, %p2274_p5  ;;  %p2311_p10 = scmp.lt.u32.totalorder %s2302_s25, %s2643_s29 }
  0x43   : > { %p2310_p4 = por %p2309_p6, %p2308_p3 }
  0x44   : > { %p2306_p13 = pneg %p2305_p11 }
  0x45   : > { %p2312_p12 = por %p2311_p10, %p2310_p4 }
  0x47   : > { %p2313_p1 = pnand %p2312_p12, %p2306_p13 }
  0x49   : > { %2316 = shalt.err (!%p2313_p1)
}
  0x4a   : > { %s2317_s24 = scalar_lea.vmem %s491_s0, 128  ;;  %s2421_s27 = smov [#allocation7]  }
  0x4b   : > { %p2318_p2 = scmp.ne.s32.totalorder %s491_s0, %s2317_s24  ;;  %s2322_s22 = sshll.u32 %s2421_s27, 4  ;;  %s2323_s22 = int_to_ptr.vmem [resolvable:$false] %s2322_s22 }
  0x4c   : > { %s2324_s18 = scalar_lea.vmem %s2323_s22, 256  ;;  %p2325_p8 = scmp.lt.s32.totalorder %s491_s0, %s2323_s22 }
  0x4d   : > { %p2320_p9 = pnand %p2318_p2, %p2274_p5  ;;  %p2326_p7 = scmp.lt.s32.totalorder %s2324_s18, %s2317_s24 }
  0x4f   : > { %p2321_p11 = pneg %p2320_p9  ;;  %p2327_p3 = por %p2326_p7, %p2325_p8 }
  0x51   : > { %p2328_p6 = pnand %p2327_p3, %p2321_p11 }
  0x53   : > { %2331 = shalt.err (!%p2328_p6)
}
  0x54   : > { %2174 = dma.hbm_to_vmem [thread:$0]  (!%p2598_p0), %s2643_s29, 128, %s491_s0, %s480_s17  }
  0x55   : > { %p2983_p13 = scmp.ne.s32.totalorder %s2980_s26, 0 }
  0x56   : > { %s2670_s25 = sand.u32 (!%p2983_p13), 1, %s2402_s19   ;;  %p2984_p8 = scmp.ne.s32.totalorder (!%p2983_p13), %s2971_s30, 0 }
  0x57   : > { %505 = sbr.rel (%p2983_p13) target bundleno = 2716 (0xa9c), region = 80  ;;  %s2673_s14 = sshll.u32 (!%p2983_p13), %s2670_s25, 3 }
  0x58   : > { %s508_s13 = scalar_lea.sflag (!%p2983_p13), [#allocation5], %s2670_s25  ;;  %s511_s15 = scalar_lea.vmem (!%p2983_p13), [#allocation4], %s2673_s14 }
  0x5e   : > { %2385 = dma.done.wait (%p2984_p8), %s508_s13, 128  }
  0x5f   : > { %2387 = vsyncadd (%p2984_p8), %s508_s13, 4294967168  ;;  %s517_s0 = scalar_lea.sflag [#allocation8], %s2670_s25  ;;  %s520_s20 = scalar_lea.vmem [#allocation7], %s2673_s14 }
  0x60   : > { %2389 = dma.done.wait (%p2984_p8), %s517_s0, 128  }
  0x61   : > { %2391 = vsyncadd (%p2984_p8), %s517_s0, 4294967168  ;;  %v2422_v0 = vmov 0.0|0.0   ;;  %vm2423_vm0 = vmmov 0   ;;  %v2424_v1 = vmov 0.0   ;;  %v584_v2 = vld [vmem:[%s2939_s3] sm:$0xff]  ;;  %v585_v3 = vld [vmem:[%s2939_s3 + $0x8] sm:$0xff]  ;;  %v829_v39 = vlaneseq }
  0x62   : > { %2126 = vmatprep.subr.bf16.mxu1 %v2422_v0  ;;  %2031 = vmatprep.mubr.msk.f32.mxu1 %vm2423_vm0, %v2424_v1  ;;  %v586_v4 = vld [vmem:[%s2939_s3 + $0x10] sm:$0xff]  ;;  %v2242_v5 = vpack.i.bf16 %v585_v3, %v584_v2  ;;  %v587_v6 = vld [vmem:[%s2939_s3 + $0x18] sm:$0xff]  ;;  %v2133_v7 = vpack.c.bf16 %v585_v3, %v584_v2  ;;  %s2425_s18 = smov 96   ;;  %v1947_v10 = vld [vmem:[%s2940_s4] ss:$0 sm:$0xff]  ;;  %vm613_vm1 = vcmask 261120  }
  0x63   : > { %2045 = vmatprep.subr.mxu0 %v2424_v1  ;;  %2047 = vmatprep.mubr.msk.f32.mxu0 %vm2423_vm0, %v2424_v1  ;;  %v2247_v8 = vpack.i.bf16 %v587_v6, %v586_v4  ;;  %v2136_v9 = vpack.c.bf16 %v587_v6, %v586_v4  ;;  %v583_v19 = vld [vmem:[%s520_s20] sm:$0xff]  ;;  %v2721_v20 = vld [vmem:[%s511_s15] sm:$0xff]  ;;  %vm687_vm2 = vcmask 64512   ;;  %s2426_s20 = smov 112   ;;  %s2427_s15 = smov 120   ;;  %v830_v42 = vshrl.u32 %v829_v39, 7 }
  0x64   : > { %2243 = vrot.lane.b32.xlu0 %v2242_v5, %s2425_s18  ;;  %610 = vrot.lane.b32.xlu1 %v1947_v10, %s2425_s18  ;;  %s2428_s26 = smov 104   ;;  %p575_p0 = scmp.lt.s32.totalorder %s2410_s21, 1  ;;  %vm1484_vm3 = vcmask 130048   ;;  %vm1486_vm4 = vcmask 195584   ;;  %vm1703_vm5 = vcmask 523264  }
  0x65   : > { %v831_v44 = vsub.s32 0, %v830_v42  ;;  %s2429_s24 = smov 88   ;;  %s2430_s27 = smov 80   ;;  %v1489_v42 = vld [vmem:[%s2941_s5 + $0x8] sm:$0xff] }
  0x66   : > { %s576_s29 = scalar_select %p575_p0, %s2410_s21, 1 }
  0x67   : > { %s2431_s22 = smov 72   ;;  %s2432_s28 = smov 8  }
  0x68   : > { %2248 = vrot.lane.b32.xlu0 %v2247_v8, %s2425_s18  ;;  %s577_s30 = scalar_lea.vmem %s2938_s2, %s576_s29  ;;  %s1809_s29 = scalar_lea.sflag [#allocation6], %s2670_s25 }
  0x69   : > { %v724_v40 = vld [vmem:[%s577_s30] sm:$0x1]  ;;  %s2433_s30 = smov 16   ;;  %p2988_p7 = scmp.ne.s32.totalorder %s2972_s16, 0 }
  0x6a   : > { %v1949_v41 = vadd.f32 -1.0, %v724_v40 }
  0x6c   : > { %v726_v43 = vmul.f32 1e+09, %v1949_v41  ;;  %v1488_v41 = vld [vmem:[%s2941_s5] sm:$0xff] }
  0x6e   : > { %v832_v45 = vrot.slane %v726_v43, %v831_v44  ;;  %v2139_v43 = vpack.c.bf16 %v1489_v42, %v1488_v41 }
  0xd6   : > { %v2244_v11 = vpop.permute.xlu0 %2243  ;;  %v611_v21 = vpop.permute.xlu1 %610 }
  0xd7   : > { %v2246_v12 = vunpack.i.h.bf16 %v2244_v11  ;;  %v2245_v13 = vunpack.i.l.bf16 %v2244_v11 }
  0xd9   : > { %v2127_v14 = vpack.c.bf16 %v2246_v12, %v2245_v13 }
  0xda   : > { %v2249_v15 = vpop.permute.xlu0 %2248 }
  0xdb   : > { %v2251_v16 = vunpack.i.h.bf16 %v2249_v15  ;;  %v2250_v17 = vunpack.i.l.bf16 %v2249_v15  ;;  %2128 = vmatpush3.bf16.msra.mxu1 %v2127_v14 }
  0xdc   : > { %2129 = vmatprep.subr.bf16.mxu1 %v2422_v0 }
  0xdd   : > { %v2130_v18 = vpack.c.bf16 %v2251_v16, %v2250_v17 }
  0xdf   : > { %2131 = vmatpush3.bf16.msra.mxu1 %v2130_v18 }
  0xe0   : > { %2132 = vmatprep.subr.bf16.mxu1 %v2422_v0 }
  0xe2   : > { %2032 = vmatmul.mubr.msk.f32.vlgmr.msra.gmra.mrb[0].mxu1 %vm613_vm1, %v583_v19 }
  0xe3   : > { %2134 = vmatpush3.bf16.msra.mxu1 %v2133_v7  ;;  %2042 = vmatprep.mubr.msk.f32.mxu1 %vm2423_vm0, %v2424_v1 }
  0xe4   : > { %2135 = vmatprep.subr.bf16.mxu1 %v2422_v0 }
  0xe7   : > { %2137 = vmatpush3.bf16.msra.mxu1 %v2136_v9 }
  0xe8   : > { %2050 = vmatprep.subr.mxu1 %v2424_v1 }
  0xea   : > { %2043 = vmatmul.mubr.msk.f32.vlgmr.msra.gmra.mrb[2].mxu1 %vm613_vm1, %v2721_v20 }
  0xeb   : > { %2052 = vmatprep.mubr.msk.f32.mxu1 %vm2423_vm0, %v2424_v1 }
 0x1b5   : > { %v683_v22 = vpop.f32.mrb[0].mxu1 }
 0x1b6   : > { %v2728_v23 = vadd.f32 %v683_v22, %v611_v21  ;;  %v2033_v24 = vpop.f32.mrb[1].mxu1 }
 0x1b8   : > { %688 = vst.msk [vmem:[#allocation2] sm:$0xff] %vm687_vm2, %v2728_v23  ;;  %704 = vrot.lane.b32.xlu0 %v2728_v23, %s2426_s20  ;;  %694 = vrot.lane.b32.xlu1 %v2728_v23, %s2427_s15 }
 0x1bc   : > { %714 = vrot.lane.b32.xlu1 %v2728_v23, %s2428_s26 }
 0x1bd   : > { %v808_v25 = vpop.f32.mrb[2].mxu1 }
 0x1be   : > { %v809_v26 = vadd.f32 %v1947_v10, %v808_v25  ;;  %v2044_v27 = vpop.f32.mrb[3].mxu1 }
 0x1bf   : > { %v820_v28 = vld [vmem:[#allocation2] sm:$0xff] }
 0x1c0   : > { %v812_v29 = vmul.f32 0.35355338, %v809_v26  ;;  %2046 = vmatpush3.xpose.msk.msra.mxu0 %vm687_vm2, %v820_v28 }
 0x1c1   : > { %2055 = vmatprep.subr.mxu0 %v2424_v1 }
 0x1c2   : > { %814 = vrot.lane.b32.xlu0 %v812_v29, %s2427_s15  ;;  %816 = vrot.lane.b32.xlu1 %v812_v29, %s2426_s20  ;;  %s2987_s15 = sld [smem:[#allocation22_spill]] }
 0x1c3   : > { %2048 = vmatmul.mubr.msk.f32.vlgmr.msra.gmra.mrb[0].mxu0 %vm687_vm2, %v812_v29 }
 0x1c4   : > { %2057 = vmatprep.mubr.msk.f32.mxu0 %vm2423_vm0, %v2424_v1 }
 0x1c6   : > { %818 = vrot.lane.b32.xlu0 %v812_v29, %s2428_s26 }
 0x22a   : > { %v705_v30 = vpop.permute.xlu0 %704  ;;  %v695_v31 = vpop.permute.xlu1 %694 }
 0x22b   : > { %708 = vst.msk [vmem:[#allocation2 + $0x10] sm:$0xff] %vm687_vm2, %v705_v30  ;;  %698 = vst.msk [vmem:[#allocation2 + $0x8] sm:$0xff] %vm687_vm2, %v695_v31 }
 0x22e   : > { %v715_v32 = vpop.permute.xlu1 %714 }
 0x22f   : > { %718 = vst.msk [vmem:[#allocation2 + $0x18] sm:$0xff] %vm687_vm2, %v715_v32 }
 0x232   : > { %v821_v33 = vld [vmem:[#allocation2 + $0x8] sm:$0xff]  ;;  %v822_v34 = vld [vmem:[#allocation2 + $0x10] sm:$0xff] }
 0x233   : > { %2051 = vmatpush3.xpose.msk.msra.mxu1 %vm687_vm2, %v821_v33  ;;  %2056 = vmatpush3.xpose.msk.msra.mxu0 %vm687_vm2, %v822_v34 }
 0x234   : > { %v815_v35 = vpop.permute.xlu0 %814  ;;  %v817_v36 = vpop.permute.xlu1 %816  ;;  %2060 = vmatprep.subr.mxu1 %v2424_v1  ;;  %2065 = vmatprep.subr.mxu0 %v2424_v1 }
 0x236   : > { %2053 = vmatmul.mubr.msk.f32.vlgmr.msra.gmra.mrb[4].mxu1 %vm687_vm2, %v815_v35  ;;  %2058 = vmatmul.mubr.msk.f32.vlgmr.msra.gmra.mrb[2].mxu0 %vm687_vm2, %v817_v36  ;;  %v823_v37 = vld [vmem:[#allocation2 + $0x18] sm:$0xff] }
 0x237   : > { %2061 = vmatpush3.xpose.msk.msra.mxu1 %vm687_vm2, %v823_v37  ;;  %2062 = vmatprep.mubr.msk.f32.mxu1 %vm2423_vm0, %v2424_v1 }
 0x238   : > { %v819_v38 = vpop.permute.xlu0 %818  ;;  %2070 = vmatprep.subr.mxu1 %v2424_v1  ;;  %2067 = vmatprep.mubr.msk.f32.mxu0 %vm2423_vm0, %v2424_v1 }
 0x23a   : > { %2063 = vmatmul.mubr.msk.f32.vlgmr.msra.gmra.mrb[6].mxu1 %vm687_vm2, %v819_v38 }
 0x23b   : > { %2072 = vmatprep.mubr.msk.f32.mxu1 %vm2423_vm0, %v2424_v1 }
 0x296   : > { %v906_v46 = vpop.f32.mrb[0].mxu0 }
 0x297   : > { %v907_v47 = vadd.f32 %v906_v46, %v832_v45  ;;  %v2049_v48 = vpop.f32.mrb[1].mxu0  ;;  %v1490_v46 = vld [vmem:[%s2941_s5 + $0x10] sm:$0xff] }
 0x299   : > { %v1135_v49 = vsel %vm687_vm2, %v907_v47, -inf }
 0x29a   : > { %1136 = vmax.xlane.f32.xlu1 %v1135_v49 }
 0x309   : > { %v981_v50 = vpop.f32.mrb[4].mxu1  ;;  %v1056_v51 = vpop.f32.mrb[2].mxu0 }
 0x30a   : > { %v982_v52 = vadd.f32 %v981_v50, %v832_v45  ;;  %v2054_v53 = vpop.f32.mrb[5].mxu1  ;;  %v2059_v54 = vpop.f32.mrb[3].mxu0  ;;  %v1057_v55 = vadd.f32 %v1056_v51, %v832_v45 }
 0x30c   : > { %v1138_v56 = vsel %vm687_vm2, %v982_v52, -inf  ;;  %v1141_v60 = vsel %vm687_vm2, %v1057_v55, -inf }
 0x30d   : > { %1139 = vmax.xlane.f32.xlu0 %v1138_v56  ;;  %v1131_v57 = vpop.f32.mrb[6].mxu1 }
 0x30e   : > { %v1132_v58 = vadd.f32 %v1131_v57, %v832_v45  ;;  %v2064_v59 = vpop.f32.mrb[7].mxu1 }
 0x310   : > { %v1144_v61 = vsel %vm687_vm2, %v1132_v58, -inf }
 0x311   : > { %1142 = vmax.xlane.f32.xlu0 %v1141_v60  ;;  %1145 = vmax.xlane.f32.xlu1 %v1144_v61  ;;  %v1964_v61 = vld [vmem:[%s2942_s6] ss:$0 sm:$0xff] }
 0x322   : > { %699 = vrot.lane.b32.xlu1 %v2728_v23, %s2429_s24  ;;  %s2434_s24 = smov 24  }
 0x327   : > { %690 = vrot.lane.b32.xlu0 %v2728_v23, %s2425_s18  ;;  %v1137_v62 = vpop.xlane.xlu1 %1136  ;;  %s574_s18 = scalar_lea.vmem [#allocation9], %s2673_s14 }
 0x328   : > { %v1147_v63 = vsub.f32 %v907_v47, %v1137_v62  ;;  %v1491_v47 = vld [vmem:[%s2941_s5 + $0x18] sm:$0xff]  ;;  %s1823_s13 = sshll.u32 %s574_s18, 4  ;;  %s2888_s13 = int_to_ptr.vmem [resolvable:$true] %s1823_s13 }
 0x329   : > { %v2142_v48 = vpack.c.bf16 %v1491_v47, %v1490_v46  ;;  %s2332_s17 = scalar_lea.vmem %s2888_s13, 128 }
 0x32a   : > { %v1151_v2 = vmul.f32 1.442695, %v1147_v63  ;;  %p2333_p5 = scmp.ne.s32.totalorder %s2888_s13, %s2332_s17 }
 0x32c   : > { %2252 = vpow2.f32 %v1151_v2  ;;  %p2334_p4 = pnand %p2333_p5, %p2988_p7 }
 0x32e   : > { %p2335_p10 = pneg %p2334_p4 }
 0x336   : > { %v2253_v3 = vpop.eup %2252 }
 0x337   : > { %v1159_v4 = vsel %vm687_vm2, %v2253_v3, 0.0 }
 0x346   : > { %1160 = vadd.xlane.f32.xlu0 %v1159_v4 }
 0x39a   : > { %v1140_v5 = vpop.xlane.xlu0 %1139 }
 0x39b   : > { %v1148_v6 = vsub.f32 %v982_v52, %v1140_v5 }
 0x39d   : > { %v1153_v7 = vmul.f32 1.442695, %v1148_v6 }
 0x39e   : > { %v1143_v8 = vpop.xlane.xlu0 %1142  ;;  %v1146_v9 = vpop.xlane.xlu1 %1145 }
 0x39f   : > { %2254 = vpow2.f32 %v1153_v7  ;;  %v1149_v10 = vsub.f32 %v1057_v55, %v1143_v8  ;;  %v1150_v11 = vsub.f32 %v1132_v58, %v1146_v9 }
 0x3a1   : > { %v1155_v12 = vmul.f32 1.442695, %v1149_v10  ;;  %v1157_v13 = vmul.f32 1.442695, %v1150_v11  ;;  %v1604_v10 = vld [vmem:[%s2945_s9 + $0x8] sm:$0xff] }
 0x3a2   : > { %v691_v14 = vpop.permute.xlu0 %690  ;;  %v700_v15 = vpop.permute.xlu1 %699 }
 0x3a3   : > { %2256 = vpow2.f32 %v1155_v12  ;;  %693 = vst.msk [vmem:[#allocation3] sm:$0xff] %vm687_vm2, %v691_v14  ;;  %703 = vst.msk [vmem:[#allocation3 + $0x8] sm:$0xff] %vm687_vm2, %v700_v15  ;;  %v1606_v12 = vld [vmem:[%s2945_s9 + $0x18] sm:$0xff]  ;;  %v1688_v14 = vld [vmem:[%s2947_s11] sm:$0xff] }
 0x3a4   : > { %2258 = vpow2.f32 %v1157_v13  ;;  %v1689_v15 = vld [vmem:[%s2947_s11 + $0x8] sm:$0xff] }
 0x3a9   : > { %v2255_v16 = vpop.eup %2254 }
 0x3aa   : > { %v824_v17 = vld [vmem:[#allocation3] sm:$0xff]  ;;  %v1162_v18 = vsel %vm687_vm2, %v2255_v16, 0.0  ;;  %v825_v19 = vld [vmem:[#allocation3 + $0x8] sm:$0xff] }
 0x3ab   : > { %2066 = vmatpush3.msra.mxu0 %v824_v17  ;;  %1163 = vadd.xlane.f32.xlu1 %v1162_v18  ;;  %v2151_v17 = vpack.c.bf16 %v1689_v15, %v1688_v14  ;;  %v1691_v18 = vld [vmem:[%s2947_s11 + $0x18] sm:$0xff] }
 0x3ac   : > { %2071 = vmatpush3.msra.mxu1 %v825_v19  ;;  %2075 = vmatprep.subr.mxu0 %v2424_v1 }
 0x3ad   : > { %v2257_v21 = vpop.eup %2256  ;;  %2080 = vmatprep.subr.mxu1 %v2424_v1 }
 0x3ae   : > { %v2259_v22 = vpop.eup %2258  ;;  %v1165_v24 = vsel %vm687_vm2, %v2257_v21, 0.0 }
 0x3af   : > { %1166 = vadd.xlane.f32.xlu0 %v1165_v24  ;;  %v1168_v25 = vsel %vm687_vm2, %v2259_v22, 0.0 }
 0x3b0   : > { %1169 = vadd.xlane.f32.xlu1 %v1168_v25 }
 0x3c1   : > { %709 = vrot.lane.b32.xlu1 %v2728_v23, %s2430_s27  ;;  %s2986_s27 = sld [smem:[#allocation21_spill]] }
 0x3c5   : > { %719 = vrot.lane.b32.xlu0 %v2728_v23, %s2431_s22  ;;  %s1975_s22 = sshll.u32 %s2410_s21, 7  ;;  %s2435_s21 = smov [#allocation9]  }
 0x3c6   : > { %s2886_s26 = scalar_lea.hbm %s2987_s15, %s1975_s22  ;;  %s2336_s14 = sshll.u32 %s2435_s21, 4  ;;  %s2337_s14 = int_to_ptr.vmem [resolvable:$false] %s2336_s14 }
 0x3c7   : > { %p2339_p12 = scmp.lt.s32.totalorder %s2888_s13, %s2337_s14 }
 0x3d3   : > { %v1161_v26 = vpop.xlane.xlu0 %1160 }
 0x3d4   : > { %2260 = vrcp.f32 %v1161_v26 }
 0x3de   : > { %v2261_v27 = vpop.eup %2260 }
 0x3df   : > { %v1175_v28 = vmul.f32 %v2261_v27, %v2253_v3 }
 0x3e1   : > { %2068 = vmatmul.mubr.msk.f32.vlgmr.msra.gmra.mrb[4].mxu0 %vm687_vm2, %v1175_v28 }
 0x3e2   : > { %2077 = vmatprep.mubr.msk.f32.mxu0 %vm2423_vm0, %v2424_v1 }
 0x438   : > { %v1164_v29 = vpop.xlane.xlu1 %1163 }
 0x439   : > { %2262 = vrcp.f32 %v1164_v29  ;;  %v1966_v29 = vld [vmem:[%s2943_s7] ss:$0 sm:$0xff] }
 0x43c   : > { %v1167_v30 = vpop.xlane.xlu0 %1166 }
 0x43d   : > { %2264 = vrcp.f32 %v1167_v30  ;;  %v1170_v31 = vpop.xlane.xlu1 %1169 }
 0x43e   : > { %2266 = vrcp.f32 %v1170_v31  ;;  %v1967_v31 = vld [vmem:[%s2944_s8] ss:$0 sm:$0xff] }
 0x440   : > { %v720_v32 = vpop.permute.xlu0 %719 }
 0x441   : > { %723 = vst.msk [vmem:[#allocation3 + $0x18] sm:$0xff] %vm687_vm2, %v720_v32  ;;  %v710_v33 = vpop.permute.xlu1 %709 }
 0x442   : > { %713 = vst.msk [vmem:[#allocation3 + $0x10] sm:$0xff] %vm687_vm2, %v710_v33 }
 0x443   : > { %v2263_v23 = vpop.eup %2262 }
 0x444   : > { %v1176_v34 = vmul.f32 %v2263_v23, %v2255_v16  ;;  %v1690_v16 = vld [vmem:[%s2947_s11 + $0x10] sm:$0xff]  ;;  %v1695_v23 = vld [vmem:[%s2947_s11 + $0x38] sm:$0xff] }
 0x445   : > { %v2154_v19 = vpack.c.bf16 %v1691_v18, %v1690_v16 }
 0x446   : > { %2073 = vmatmul.mubr.msk.f32.vlgmr.msra.gmra.mrb[8].mxu1 %vm687_vm2, %v1176_v34 }
 0x447   : > { %v2265_v35 = vpop.eup %2264  ;;  %2082 = vmatprep.mubr.msk.f32.mxu1 %vm2423_vm0, %v2424_v1 }
 0x448   : > { %v2267_v36 = vpop.eup %2266  ;;  %v1177_v37 = vmul.f32 %v2265_v35, %v2257_v21  ;;  %v827_v38 = vld [vmem:[#allocation3 + $0x18] sm:$0xff]  ;;  %v1692_v21 = vld [vmem:[%s2947_s11 + $0x20] sm:$0xff] }
 0x449   : > { %v1178_v39 = vmul.f32 %v2267_v36, %v2259_v22  ;;  %v826_v40 = vld [vmem:[#allocation3 + $0x10] sm:$0xff]  ;;  %2081 = vmatpush3.msra.mxu1 %v827_v38  ;;  %v1693_v22 = vld [vmem:[%s2947_s11 + $0x28] sm:$0xff]  ;;  %v1968_v35 = vld [vmem:[%s2946_s10] ss:$0 sm:$0xff] }
 0x44a   : > { %2076 = vmatpush3.msra.mxu0 %v826_v40  ;;  %2144 = vmatprep.subr.bf16.mxu1 %v2422_v0  ;;  %v2157_v24 = vpack.c.bf16 %v1693_v22, %v1692_v21  ;;  %v1970_v40 = vld [vmem:[%s2948_s12] ss:$0 sm:$0xff] }
 0x44b   : > { %2078 = vmatmul.mubr.msk.f32.vlgmr.msra.gmra.mrb[6].mxu0 %vm687_vm2, %v1177_v37  ;;  %2083 = vmatmul.mubr.msk.f32.vlgmr.msra.gmra.mrb[10].mxu1 %vm687_vm2, %v1178_v39 }
 0x44c   : > { %2138 = vmatprep.subr.bf16.mxu0 %v2422_v0  ;;  %2093 = vmatprep.mubr.msk.f32.mxu0 %vm2423_vm0, %v2424_v1 }
 0x44d   : > { %2104 = vmatprep.mubr.msk.f32.mxu1 %vm2423_vm0, %v2424_v1  ;;  %2140 = vmatpush3.bf16.msra.mxu0 %v2139_v43 }
 0x44e   : > { %2141 = vmatprep.subr.bf16.mxu0 %v2422_v0 }
 0x451   : > { %2143 = vmatpush3.bf16.msra.mxu0 %v2142_v48 }
 0x452   : > { %2150 = vmatprep.subr.bf16.mxu0 %v2422_v0 }
 0x4b4   : > { %v1248_v44 = vpop.f32.mrb[4].mxu0 }
 0x4b5   : > { %v2069_v45 = vpop.f32.mrb[5].mxu0 }
 0x519   : > { %v1321_v49 = vpop.f32.mrb[8].mxu1 }
 0x51a   : > { %1472 = vrot.lane.b32.xlu1 %v1321_v49, %s2432_s28  ;;  %v2074_v50 = vpop.f32.mrb[9].mxu1  ;;  %s2985_s28 = sld [smem:[#allocation20_spill]] }
 0x51e   : > { %v1394_v51 = vpop.f32.mrb[6].mxu0  ;;  %v1467_v52 = vpop.f32.mrb[10].mxu1 }
 0x51f   : > { %1476 = vrot.lane.b32.xlu0 %v1394_v51, %s2433_s30  ;;  %v2079_v53 = vpop.f32.mrb[7].mxu0  ;;  %1480 = vrot.lane.b32.xlu1 %v1467_v52, %s2434_s24  ;;  %v2084_v54 = vpop.f32.mrb[11].mxu1 }
 0x58c   : > { %v1473_v55 = vpop.permute.xlu1 %1472 }
 0x58d   : > { %v1483_v56 = vsel %vm687_vm2, %v1248_v44, %v1473_v55  ;;  %v1972_v55 = vld [vmem:[%s2985_s28] ss:$0 sm:$0xff]  ;;  %s2338_s28 = scalar_lea.vmem %s2337_s14, 256 }
 0x58e   : > { %p2340_p1 = scmp.lt.s32.totalorder %s2338_s28, %s2332_s17 }
 0x590   : > { %p2341_p2 = por %p2340_p1, %p2339_p12 }
 0x591   : > { %v1477_v57 = vpop.permute.xlu0 %1476  ;;  %v1481_v58 = vpop.permute.xlu1 %1480 }
 0x592   : > { %v1485_v59 = vsel %vm1484_vm3, %v1483_v56, %v1477_v57  ;;  %v1973_v57 = vld [vmem:[%s2986_s27] ss:$0 sm:$0xff]  ;;  %p2342_p9 = pnand %p2341_p2, %p2335_p10 }
 0x593   : > { %v1487_v60 = vsel %vm1486_vm4, %v1485_v59, %v1481_v58 }
 0x594   : > { %2094 = vmatmul.mubr.msk.f32.vlgmr.msra.gmra.mrb[8].mxu0 %vm613_vm1, %v1487_v60 }
 0x595   : > { %2123 = vmatprep.mubr.msk.f32.mxu0 %vm2423_vm0, %v2424_v1  ;;  %v1603_v1 = vld [vmem:[%s2945_s9] sm:$0xff]  ;;  %2152 = vmatpush3.bf16.msra.mxu0 %v2151_v17 }
 0x596   : > { %v2145_v11 = vpack.c.bf16 %v1604_v10, %v1603_v1  ;;  %2153 = vmatprep.subr.bf16.mxu0 %v2422_v0 }
 0x598   : > { %2146 = vmatpush3.bf16.msra.mxu1 %v2145_v11 }
 0x599   : > { %2147 = vmatprep.subr.bf16.mxu1 %v2422_v0  ;;  %2155 = vmatpush3.bf16.msra.mxu0 %v2154_v19 }
 0x59a   : > { %2156 = vmatprep.subr.bf16.mxu0 %v2422_v0 }
 0x59d   : > { %2158 = vmatpush3.bf16.msra.mxu0 %v2157_v24 }
 0x59e   : > { %2159 = vmatprep.subr.bf16.mxu0 %v2422_v0  ;;  %v1694_v0 = vld [vmem:[%s2947_s11 + $0x30] sm:$0xff] }
 0x59f   : > { %v2160_v34 = vpack.c.bf16 %v1695_v23, %v1694_v0 }
 0x5a1   : > { %2161 = vmatpush3.bf16.msra.mxu0 %v2160_v34 }
 0x667   : > { %v1568_v62 = vpop.f32.mrb[8].mxu0 }
 0x668   : > { %v1569_v63 = vadd.f32 %v1964_v61, %v1568_v62  ;;  %v2095_v2 = vpop.f32.mrb[9].mxu0 }
 0x66a   : > { %v1572_v3 = vadd.f32 %v1569_v63, %v2721_v20  ;;  %v1605_v20 = vld [vmem:[%s2945_s9 + $0x10] sm:$0xff] }
 0x66b   : > { %v2148_v13 = vpack.c.bf16 %v1606_v12, %v1605_v20 }
 0x66c   : > { %v1573_v4 = vsel %vm613_vm1, %v1572_v3, 0.0 }
 0x66d   : > { %1574 = vadd.xlane.f32.xlu0 %v1573_v4  ;;  %2149 = vmatpush3.bf16.msra.mxu1 %v2148_v13 }
 0x6fa   : > { %v1575_v5 = vpop.xlane.xlu0 %1574 }
 0x6fb   : > { %v1577_v6 = vmul.f32 0.03125, %v1575_v5 }
 0x6fd   : > { %v1578_v7 = vsub.f32 %v1572_v3, %v1577_v6 }
 0x6ff   : > { %v1579_v8 = vmul.f32 %v1578_v7, %v1578_v7 }
 0x701   : > { %v1580_v9 = vsel %vm613_vm1, %v1579_v8, 0.0 }
 0x702   : > { %1581 = vadd.xlane.f32.xlu1 %v1580_v9 }
 0x78f   : > { %v1582_v25 = vpop.xlane.xlu1 %1581 }
 0x790   : > { %v1583_v26 = vmul.f32 0.03125, %v1582_v25 }
 0x792   : > { %v1584_v27 = vadd.f32 1e-05, %v1583_v26 }
 0x794   : > { %2268 = vrsqrt.f32 %v1584_v27 }
 0x79e   : > { %v2269_v28 = vpop.eup %2268 }
 0x79f   : > { %v1586_v30 = vmul.f32 %v2269_v28, %v1578_v7 }
 0x7a1   : > { %v1594_v32 = vmul.f32 %v1966_v29, %v1586_v30 }
 0x7a3   : > { %v1602_v33 = vadd.f32 %v1967_v31, %v1594_v32 }
 0x7a5   : > { %2105 = vmatmul.mubr.msk.f32.vlgmr.msra.gmra.mrb[12].mxu1 %vm613_vm1, %v1602_v33 }
 0x878   : > { %v1683_v36 = vpop.f32.mrb[12].mxu1 }
 0x879   : > { %v1684_v37 = vadd.f32 %v1968_v35, %v1683_v36  ;;  %v2106_v38 = vpop.f32.mrb[13].mxu1 }
 0x87b   : > { %v1687_v39 = vmax.f32 %v1684_v37, 0.0 }
 0x87d   : > { %2124 = vmatmul.mubr.msk.f32.vlgmr.msra.gmra.mrb[10].mxu0 %vm1703_vm5, %v1687_v39 }
 0x950   : > { %v1773_v41 = vpop.f32.mrb[10].mxu0 }
 0x951   : > { %v1774_v42 = vadd.f32 %v1970_v40, %v1773_v41  ;;  %v2125_v43 = vpop.f32.mrb[11].mxu0 }
 0x953   : > { %v1777_v44 = vadd.f32 %v1774_v42, %v1602_v33 }
 0x955   : > { %v1778_v45 = vsel %vm613_vm1, %v1777_v44, 0.0 }
 0x956   : > { %1779 = vadd.xlane.f32.xlu0 %v1778_v45 }
 0x9e3   : > { %v1780_v46 = vpop.xlane.xlu0 %1779 }
 0x9e4   : > { %v1781_v47 = vmul.f32 0.03125, %v1780_v46 }
 0x9e6   : > { %v1782_v48 = vsub.f32 %v1777_v44, %v1781_v47 }
 0x9e8   : > { %v1783_v49 = vmul.f32 %v1782_v48, %v1782_v48 }
 0x9ea   : > { %v1784_v50 = vsel %vm613_vm1, %v1783_v49, 0.0 }
 0x9eb   : > { %1785 = vadd.xlane.f32.xlu0 %v1784_v50 }
 0xa78   : > { %v1786_v51 = vpop.xlane.xlu0 %1785 }
 0xa79   : > { %v1787_v52 = vmul.f32 0.03125, %v1786_v51 }
 0xa7b   : > { %v1788_v53 = vadd.f32 1e-05, %v1787_v52 }
 0xa7d   : > { %2270 = vrsqrt.f32 %v1788_v53 }
 0xa87   : > { %v2271_v54 = vpop.eup %2270 }
 0xa88   : > { %v1790_v56 = vmul.f32 %v2271_v54, %v1782_v48 }
 0xa8a   : > { %v1798_v58 = vmul.f32 %v1972_v55, %v1790_v56 }
 0xa8c   : > { %v1806_v59 = vadd.f32 %v1973_v57, %v1798_v58 }
 0xa8e   : > { %1807 = vst.msk [vmem:[%s574_s18] sm:$0xff] %vm613_vm1, %v1806_v59 }
 0xa8f   : > { %2345 = shalt.err (!%p2342_p9)
}
 0xa90   : > { %s2346_s25 = scalar_lea.hbm %s2886_s26, 128  ;;  %s2350_s27 = scalar_lea.hbm %s2987_s15, 256 }
 0xa91   : > { %p2347_p11 = scmp.ne.s32.totalorder %s2886_s26, %s2346_s25  ;;  %p2351_p13 = scmp.lt.u32.totalorder %s2886_s26, %s2987_s15 }
 0xa92   : > { %p2352_p8 = scmp.lt.u32.totalorder %s2350_s27, %s2346_s25  ;;  %p2354_p5 = scmp.lt.u32.totalorder %s2346_s25, %s2886_s26 }
 0xa93   : > { %p2348_p3 = pnand %p2347_p11, %p2988_p7 }
 0xa94   : > { %p2353_p0 = por %p2352_p8, %p2351_p13 }
 0xa95   : > { %p2349_p6 = pneg %p2348_p3 }
 0xa96   : > { %p2355_p4 = por %p2354_p5, %p2353_p0 }
 0xa98   : > { %p2356_p10 = pnand %p2355_p4, %p2349_p6 }
 0xa9a   : > { %2359 = shalt.err (!%p2356_p10)
}
 0xa9b   : > { %2166 = dma.vmem_to_hbm [thread:$0]  (%p2988_p7), %s2888_s13, 128, %s2886_s26, %s1809_s29  }
 0xa9c PF: > { %s2989_s0 = sld [smem:[#allocation13_spill]]  ;;  %s2990_s20 = sld [smem:[#allocation18_spill]] }
 0xa9d   : > { %p2992_p1 = scmp.ge.s32.totalorder %s2418_s23, 2 }
 0xaa2   : > { %s1835_s17 = sand.u32 1, %s2989_s0   ;;  %p2991_p12 = scmp.ne.s32.totalorder %s2990_s20, 0 }
 0xaa3   : > { %s1836_s21 = scalar_lea.sflag [#allocation6], %s1835_s17 }
 0xaa4   : > { %p2176_p2 = pnand %p2992_p1, %p2991_p12 }
 0xaa6   : > { %2393 = dma.done.wait (!%p2176_p2), %s1836_s21, 128  }
 0xaa7   : > { %2395 = vsyncadd (!%p2176_p2), %s1836_s21, 4294967168  ;;  %s34_s23 = sadd.s32 1, %s2418_s23   ;;  %s2993_s14 = sld [smem:[#allocation14_spill]] }
 0xaa8   : > { %p31_p9 = scmp.ge.s32.totalorder %s34_s23, 4   ;;  %s2994_s20 = sld [smem:[#allocation17_spill]] }
 0xaa9   : > { %s2995_s21 = sld [smem:[#allocation15_spill]]  ;;  %s2996_s22 = sld [smem:[#allocation16_spill]] }
 0xaaa   : > { %s2997_s18 = smov %s2402_s19  ;;  %33 = sbr.rel (!%p31_p9) target bundleno = 13 (0xd), region = 151 }
 0xaad   : > { %s2998_s19 = smov %s2993_s14 }
 0xab1   :  { %1841 = vsyncpa [#allocation5], 1 }
 0xab2   :  { %1843 = vsyncpa [#allocation5 + $0x1], 1 }
 0xab3   :  { %1844 = vsyncpa [#allocation8], 1 }
 0xab4   :  { %1846 = vsyncpa [#allocation8 + $0x1], 1 }
 0xab5   :  { %1847 = vsyncpa [#allocation6], 1 }
 0xab6   :  { %1849 = vsyncpa [#allocation6 + $0x1], 1 }

</bundles_post_ra>
